<compile_context>
chip_gen: v6e
topology: v6e:2x2x1
jax: 0.10.0
libtpu: 0.0.40
codegen_flags: <defaults>
</compile_context>

<pallas_src>
import jax
import jax.numpy as jnp
from jax import lax
from jax.experimental import pallas as pl
from jax.experimental.pallas import tpu as pltpu


def _round_up(x, m):
    return (x + m - 1) // m * m


# ----------------------------------------------------------------------------
# Kernel 1: proj + 2-layer highway + LSTM input-gate pre-activations (fwd|bwd)
# ----------------------------------------------------------------------------
def _embed_kernel(x_ref, wp_ref, w0_ref, b0_ref, w1_ref, b1_ref,
                  wih_ref, big_ref, out_ref):
    Hp = wp_ref.shape[1]
    x = x_ref[...]                                               # (TN, Ep) bf16
    h = jnp.dot(x, wp_ref[...], preferred_element_type=jnp.float32)   # (TN, Hp) f32
    # two highway layers, statically unrolled; transform|gate fused per layer
    for w_ref, b_ref in ((w0_ref, b0_ref), (w1_ref, b1_ref)):
        y = jnp.dot(h.astype(jnp.bfloat16), w_ref[...],
                    preferred_element_type=jnp.float32) + b_ref[...]   # (TN, 2Hp)
        t = jnp.maximum(y[:, 0:Hp], 0.0)
        g = jax.nn.sigmoid(y[:, Hp:2 * Hp])
        h = g * t + (1.0 - g) * h
    # hoisted LSTM input projection for both directions:
    # columns = [fwd: i|f|o|g | bwd: i|f|o|g], each block Hp wide, bias folded in
    ig = jnp.dot(h.astype(jnp.bfloat16), wih_ref[...],
                 preferred_element_type=jnp.float32) + big_ref[...]
    out_ref[...] = ig


def embed_proj_highway_ig(x_flat, kp, tile_n):
    n_pad, ep = x_flat.shape
    hp = kp["wp"].shape[1]
    res = lambda i: (0, 0)   # resident weights
    return pl.pallas_call(
        _embed_kernel,
        out_shape=jax.ShapeDtypeStruct((n_pad, 8 * hp), jnp.float32),
        grid=(n_pad // tile_n,),
        in_specs=[
            pl.BlockSpec((tile_n, ep), lambda i: (i, 0)),
            pl.BlockSpec(kp["wp"].shape, res),
            pl.BlockSpec(kp["whw0"].shape, res),
            pl.BlockSpec(kp["bhw0"].shape, res),
            pl.BlockSpec(kp["whw1"].shape, res),
            pl.BlockSpec(kp["bhw1"].shape, res),
            pl.BlockSpec(kp["wih_all"].shape, res),
            pl.BlockSpec(kp["b_ig"].shape, res),
        ],
        out_specs=pl.BlockSpec((tile_n, 8 * hp), lambda i: (i, 0)),
        compiler_params=pltpu.CompilerParams(
            dimension_semantics=("parallel",),
            vmem_limit_bytes=32 * 1024 * 1024),
    )(x_flat, kp["wp"], kp["whw0"], kp["bhw0"], kp["whw1"], kp["bhw1"],
      kp["wih_all"], kp["b_ig"])


# ----------------------------------------------------------------------------
# Kernel 2: masked bidirectional LSTM recurrence (input proj precomputed)
# ----------------------------------------------------------------------------
def _bilstm_kernel(ig_ref, lens_ref, whh_f_ref, whh_b_ref, out_ref,
                   hf, cf, hb, cb):
    L, TB, G8 = ig_ref.shape
    Hp = G8 // 8
    H4 = 4 * Hp

    hf[...] = jnp.zeros((TB, Hp), jnp.float32)
    cf[...] = jnp.zeros((TB, Hp), jnp.float32)
    hb[...] = jnp.zeros((TB, Hp), jnp.float32)
    cb[...] = jnp.zeros((TB, Hp), jnp.float32)
    lens_v = lens_ref[...]                                       # (TB, 1) int32

    def cell(ig_t, h_prev, c_prev, whh_ref):
        # gates = precomputed (x @ W_ih + b) + h_prev @ W_hh ; layout [i|f|o|g]
        gates = ig_t + jnp.dot(h_prev.astype(jnp.bfloat16), whh_ref[...],
                               preferred_element_type=jnp.float32)   # (TB, 4Hp)
        s = jax.nn.sigmoid(gates[:, 0:3 * Hp])                   # i, f, o
        g = jnp.tanh(gates[:, 3 * Hp:4 * Hp])
        i = s[:, 0:Hp]
        f = s[:, Hp:2 * Hp]
        o = s[:, 2 * Hp:3 * Hp]
        c_new = f * c_prev + i * g
        h_new = o * jnp.tanh(c_new)
        return h_new, c_new

    def step(t, carry):
        tb = L - 1 - t
        # ---- forward direction (time t) ----
        mask_f = t < lens_v                                      # (TB, 1)
        hf_new, cf_new = cell(ig_ref[t, :, 0:H4], hf[...], cf[...], whh_f_ref)
        hf[...] = jnp.where(mask_f, hf_new, hf[...])
        cf[...] = jnp.where(mask_f, cf_new, cf[...])
        out_ref[t, :, 0:Hp] = jnp.where(mask_f, hf_new, 0.0)
        # ---- backward direction (time tb = L-1-t); padded tail masked, which
        #      reproduces pack_padded_sequence per-sequence reversal ----
        mask_b = tb < lens_v
        hb_new, cb_new = cell(ig_ref[tb, :, H4:2 * H4], hb[...], cb[...],
                              whh_b_ref)
        hb[...] = jnp.where(mask_b, hb_new, hb[...])
        cb[...] = jnp.where(mask_b, cb_new, cb[...])
        out_ref[tb, :, Hp:2 * Hp] = jnp.where(mask_b, hb_new, 0.0)
        return carry

    lax.fori_loop(0, L, step, 0, unroll=2)


def bilstm(ig_tm, lens2d, whh_f, whh_b, tb=8):
    L, b_pad, g8 = ig_tm.shape
    hp = g8 // 8
    res = lambda b: (0, 0)
    return pl.pallas_call(
        _bilstm_kernel,
        out_shape=jax.ShapeDtypeStruct((L, b_pad, 2 * hp), jnp.float32),
        grid=(b_pad // tb,),
        in_specs=[
            pl.BlockSpec((L, tb, g8), lambda b: (0, b, 0)),
            pl.BlockSpec((tb, 1), lambda b: (b, 0)),
            pl.BlockSpec(whh_f.shape, res),
            pl.BlockSpec(whh_b.shape, res),
        ],
        out_specs=pl.BlockSpec((L, tb, 2 * hp), lambda b: (0, b, 0)),
        scratch_shapes=[pltpu.VMEM((tb, hp), jnp.float32)] * 4,
        compiler_params=pltpu.CompilerParams(
            dimension_semantics=("parallel",),
            vmem_limit_bytes=48 * 1024 * 1024),
    )(ig_tm, lens2d, whh_f, whh_b)


# ----------------------------------------------------------------------------
# Parameter prep: PyTorch-layout weights -> padded / fused / bf16 kernel layout
# ----------------------------------------------------------------------------
def prepare_kernel_params(p):
    H, E = p["w_proj"].shape
    Ep = _round_up(E, 128)
    Hp = _round_up(H, 128)

    def pad2(w, rows, cols):
        return jnp.pad(w, ((0, rows - w.shape[0]), (0, cols - w.shape[1])))

    wp = pad2(p["w_proj"].T, Ep, Hp).astype(jnp.bfloat16)        # (Ep, Hp)

    def highway(l):
        wt = pad2(p[f"wt{l}"].T, Hp, Hp)
        wg = pad2(p[f"wg{l}"].T, Hp, Hp)
        w = jnp.concatenate([wt, wg], axis=1).astype(jnp.bfloat16)   # (Hp, 2Hp)
        b = jnp.concatenate([jnp.pad(p[f"bt{l}"], (0, Hp - H)),
                             jnp.pad(p[f"bg{l}"], (0, Hp - H))])[None, :]
        return w, b.astype(jnp.float32)

    whw0, bhw0 = highway(0)
    whw1, bhw1 = highway(1)

    # PyTorch LSTM gate order is [i, f, g, o]; kernel uses [i, f, o, g] so the
    # three sigmoids act on one contiguous 3*Hp slice and tanh on the last Hp.
    def lstm_w(w):                                               # (4H, H)
        blocks = [w[0:H], w[H:2 * H], w[3 * H:4 * H], w[2 * H:3 * H]]
        blocks = [pad2(b_, Hp, Hp) for b_ in blocks]
        return jnp.concatenate(blocks, axis=0).T                 # (Hp, 4Hp)

    def lstm_b(bih, bhh):                                        # b = b_ih + b_hh
        b = bih + bhh
        blocks = [b[0:H], b[H:2 * H], b[3 * H:4 * H], b[2 * H:3 * H]]
        return jnp.concatenate([jnp.pad(x_, (0, Hp - H)) for x_ in blocks])[None, :]

    wih_f = lstm_w(p["wih_f"])
    wih_b = lstm_w(p["wih_b"])
    whh_f = lstm_w(p["whh_f"]).astype(jnp.bfloat16)
    whh_b = lstm_w(p["whh_b"]).astype(jnp.bfloat16)
    b_f = lstm_b(p["bih_f"], p["bhh_f"])
    b_b = lstm_b(p["bih_b"], p["bhh_b"])

    wih_all = jnp.concatenate([wih_f, wih_b], axis=1).astype(jnp.bfloat16)  # (Hp, 8Hp)
    b_ig = jnp.concatenate([b_f, b_b], axis=1).astype(jnp.float32)          # (1, 8Hp)

    return dict(Ep=Ep, Hp=Hp, wp=wp, whw0=whw0, bhw0=bhw0, whw1=whw1,
                bhw1=bhw1, wih_all=wih_all, b_ig=b_ig, whh_f=whh_f,
                whh_b=whh_b)


# ----------------------------------------------------------------------------
# Full BiDAFEmbeddingLayer forward
# ----------------------------------------------------------------------------
def bidaf_embedding_forward(x_word, x_lens, p):
    kp = prepare_kernel_params(p)
    H = p["w_proj"].shape[0]
    E = p["embedding"].shape[1]
    Ep, Hp = kp["Ep"], kp["Hp"]
    B, L = x_word.shape
    TB = 8
    B_pad = _round_up(B, TB)

    # pad batch; padded rows use padding_idx and length 0 -> masked to zero
    x_word_p = jnp.pad(x_word, ((0, B_pad - B), (0, 0)), constant_values=1)
    lens_p = jnp.pad(x_lens.astype(jnp.int32), (0, B_pad - B))

    # word embedding lookup (XLA gather glue), time-major from the start
    x = jnp.take(p["embedding"], x_word_p.T, axis=0)             # (L, B_pad, E)
    # word_embedding_dropout: eval mode -> identity
    x = jnp.pad(x, ((0, 0), (0, 0), (0, Ep - E)))                # (L, B_pad, Ep)

    N = L * B_pad
    tile_n = 512 if N >= 512 else _round_up(N, 8)
    N_pad = _round_up(N, tile_n)
    x_flat = x.reshape(N, Ep).astype(jnp.bfloat16)
    if N_pad != N:
        x_flat = jnp.pad(x_flat, ((0, N_pad - N), (0, 0)))

    # kernel 1: proj + highway + LSTM input projections, tiled over N
    ig_flat = embed_proj_highway_ig(x_flat, kp, tile_n)          # (N_pad, 8Hp)
    ig = ig_flat[:N].reshape(L, B_pad, 8 * Hp)

    # kernel 2: masked bidirectional recurrence, tiled over batch
    lens2d = lens_p.reshape(B_pad, 1)
    out_tm = bilstm(ig, lens2d, kp["whh_f"], kp["whh_b"], tb=TB)  # (L,B_pad,2Hp)

    # encoder dropout: eval mode -> identity
    out = jnp.transpose(out_tm, (1, 0, 2))[:B]                   # (B, L, 2Hp)
    out = jnp.concatenate([out[..., :H], out[..., Hp:Hp + H]], axis=-1)
    return out                                                   # (B, L, 2H)


# ----------------------------------------------------------------------------
# Pure-JAX f32 reference (PyTorch semantics) for validation
# ----------------------------------------------------------------------------
def reference_forward(x_word, x_lens, p):
    x = jnp.take(p["embedding"], x_word, axis=0)                 # (B, L, E)
    h = x @ p["w_proj"].T                                        # (B, L, H)
    for l in range(2):
        t = jax.nn.relu(h @ p[f"wt{l}"].T + p[f"bt{l}"])
        g = jax.nn.sigmoid(h @ p[f"wg{l}"].T + p[f"bg{l}"])
        h = g * t + (1.0 - g) * h
    B, L, H = h.shape

    def run_dir(wih, whh, bias, reverse):
        hs = jnp.zeros((B, H), jnp.float32)
        cs = jnp.zeros((B, H), jnp.float32)
        outs = [None] * L
        order = range(L - 1, -1, -1) if reverse else range(L)
        for idx in order:
            x_t = h[:, idx, :]
            gates = x_t @ wih.T + hs @ whh.T + bias
            i = jax.nn.sigmoid(gates[:, 0 * H:1 * H])
            f = jax.nn.sigmoid(gates[:, 1 * H:2 * H])
            g = jnp.tanh(gates[:, 2 * H:3 * H])
            o = jax.nn.sigmoid(gates[:, 3 * H:4 * H])
            c_new = f * cs + i * g
            h_new = o * jnp.tanh(c_new)
            mask = (idx < x_lens)[:, None]
            hs = jnp.where(mask, h_new, hs)
            cs = jnp.where(mask, c_new, cs)
            outs[idx] = jnp.where(mask, h_new, 0.0)
        return jnp.stack(outs, axis=1)                           # (B, L, H)

    out_f = run_dir(p["wih_f"], p["whh_f"], p["bih_f"] + p["bhh_f"], False)
    out_b = run_dir(p["wih_b"], p["whh_b"], p["bih_b"] + p["bhh_b"], True)
    return jnp.concatenate([out_f, out_b], axis=-1)


# ----------------------------------------------------------------------------
# Deterministic parameter construction (PyTorch-native layout; synthetic)
# ----------------------------------------------------------------------------
def make_params(key, vocab, E, H):
    ks = jax.random.split(key, 18)
    sc = 0.1

    def w(k, shape):
        return (sc * jax.random.normal(k, shape)).astype(jnp.float32)

    emb = w(ks[0], (vocab, E)).at[1].set(0.0)                    # padding_idx = 1
    return {
        "embedding": emb,
        "w_proj": w(ks[1], (H, E)),                              # Linear(E,H,no bias)
        "wt0": w(ks[2], (H, H)), "bt0": w(ks[3], (H,)),
        "wg0": w(ks[4], (H, H)), "bg0": w(ks[5], (H,)),
        "wt1": w(ks[6], (H, H)), "bt1": w(ks[7], (H,)),
        "wg1": w(ks[8], (H, H)), "bg1": w(ks[9], (H,)),
        # LSTM (1 layer, bidirectional), PyTorch gate order [i, f, g, o]
        "wih_f": w(ks[10], (4 * H, H)), "whh_f": w(ks[11], (4 * H, H)),
        "bih_f": w(ks[12], (4 * H,)), "bhh_f": w(ks[13], (4 * H,)),
        "wih_b": w(ks[14], (4 * H, H)), "whh_b": w(ks[15], (4 * H, H)),
        "bih_b": w(ks[16], (4 * H,)), "bhh_b": w(ks[17], (4 * H,)),
    }


if __name__ == "__main__":
    B, L = 2, 8
    VOCAB, E, H = 50, 16, 32

    key = jax.random.PRNGKey(0)
    k_params, k_words = jax.random.split(key)
    params = make_params(k_params, VOCAB, E, H)

    x_word = jax.random.randint(k_words, (B, L), 0, VOCAB, dtype=jnp.int32)
    x_lens = jnp.array([L, 5], dtype=jnp.int32)                  # max len == L

    out = bidaf_embedding_forward(x_word, x_lens, params)
    out = jax.block_until_ready(out)

    assert out.shape == (B, L, 2 * H), out.shape
    assert bool(jnp.all(jnp.isfinite(out)))
    # padded positions of the short sequence must be zero (pad_packed_sequence)
    assert bool(jnp.all(out[1, 5:, :] == 0.0))

    ref = reference_forward(x_word, x_lens, params)
    err = float(jnp.max(jnp.abs(out - ref)))
    assert err < 2e-2, f"max abs err vs f32 reference: {err}"
    print("KERNEL_OK")
</pallas_src>

<mosaic_0001>
module attributes {stable_mosaic.version = 11 : i64} {
  func.func @_embed_kernel(%arg0: i32, %arg1: memref<64x128xbf16, #tpu.memory_space<vmem>>, %arg2: memref<128x128xbf16, #tpu.memory_space<vmem>>, %arg3: memref<128x256xbf16, #tpu.memory_space<vmem>>, %arg4: memref<1x256xf32, #tpu.memory_space<vmem>>, %arg5: memref<128x256xbf16, #tpu.memory_space<vmem>>, %arg6: memref<1x256xf32, #tpu.memory_space<vmem>>, %arg7: memref<128x1024xbf16, #tpu.memory_space<vmem>>, %arg8: memref<1x1024xf32, #tpu.memory_space<vmem>>, %arg9: memref<64x1024xf32, #tpu.memory_space<vmem>>) attributes {dimension_semantics = [#tpu.dimension_semantics<parallel>], iteration_bounds = array<i64: 1>, scalar_prefetch = 0 : i64, scratch_operands = 0 : i64, tpu.core_type = #tpu.core_type<tc>, window_params = [{transform_indices = @transform_0, window_bounds = array<i64: 64, 128>}, {pipeline_mode = #tpu.pipeline_mode<synchronous>, transform_indices = @transform_1, window_bounds = array<i64: 128, 128>}, {pipeline_mode = #tpu.pipeline_mode<synchronous>, transform_indices = @transform_2, window_bounds = array<i64: 128, 256>}, {pipeline_mode = #tpu.pipeline_mode<synchronous>, transform_indices = @transform_3, window_bounds = array<i64: 1, 256>}, {pipeline_mode = #tpu.pipeline_mode<synchronous>, transform_indices = @transform_4, window_bounds = array<i64: 128, 256>}, {pipeline_mode = #tpu.pipeline_mode<synchronous>, transform_indices = @transform_5, window_bounds = array<i64: 1, 256>}, {pipeline_mode = #tpu.pipeline_mode<synchronous>, transform_indices = @transform_6, window_bounds = array<i64: 128, 1024>}, {pipeline_mode = #tpu.pipeline_mode<synchronous>, transform_indices = @transform_7, window_bounds = array<i64: 1, 1024>}, {transform_indices = @transform_8, window_bounds = array<i64: 64, 1024>}]} {
    %c0 = arith.constant 0 : index
    %c0_0 = arith.constant 0 : index
    %0 = vector.load %arg1[%c0, %c0_0] : memref<64x128xbf16, #tpu.memory_space<vmem>>, vector<64x128xbf16>
    %c0_1 = arith.constant 0 : index
    %c0_2 = arith.constant 0 : index
    %1 = vector.load %arg2[%c0_1, %c0_2] : memref<128x128xbf16, #tpu.memory_space<vmem>>, vector<128x128xbf16>
    %cst = arith.constant dense<0.000000e+00> : vector<64x128xf32>
    %2 = tpu.matmul %0, %1, %cst {dimension_numbers = #tpu.dot_dimension_numbers<[1], [0], [0], [1], [0, 0, 1, 1], [], []>} : vector<64x128xbf16>, vector<128x128xbf16>, vector<64x128xf32> -> vector<64x128xf32>
    %3 = arith.truncf %2 : vector<64x128xf32> to vector<64x128xbf16>
    %c0_3 = arith.constant 0 : index
    %c0_4 = arith.constant 0 : index
    %4 = vector.load %arg3[%c0_3, %c0_4] : memref<128x256xbf16, #tpu.memory_space<vmem>>, vector<128x256xbf16>
    %cst_5 = arith.constant dense<0.000000e+00> : vector<64x256xf32>
    %5 = tpu.matmul %3, %4, %cst_5 {dimension_numbers = #tpu.dot_dimension_numbers<[1], [0], [0], [1], [0, 0, 1, 1], [], []>} : vector<64x128xbf16>, vector<128x256xbf16>, vector<64x256xf32> -> vector<64x256xf32>
    %c0_6 = arith.constant 0 : index
    %c0_7 = arith.constant 0 : index
    %6 = vector.load %arg4[%c0_6, %c0_7] : memref<1x256xf32, #tpu.memory_space<vmem>>, vector<1x256xf32>
    %7 = vector.broadcast %6 : vector<1x256xf32> to vector<64x256xf32>
    %8 = arith.addf %5, %7 : vector<64x256xf32>
    %9 = vector.extract_strided_slice %8 {offsets = [0, 0], sizes = [64, 128], strides = [1, 1]} : vector<64x256xf32> to vector<64x128xf32>
    %cst_8 = arith.constant 0.000000e+00 : f32
    %10 = vector.broadcast %cst_8 : f32 to vector<64x128xf32>
    %11 = arith.maximumf %9, %10 : vector<64x128xf32>
    %12 = vector.extract_strided_slice %8 {offsets = [0, 128], sizes = [64, 128], strides = [1, 1]} : vector<64x256xf32> to vector<64x128xf32>
    %13 = arith.negf %12 : vector<64x128xf32>
    %14 = math.exp %13 : vector<64x128xf32>
    %cst_9 = arith.constant 1.000000e+00 : f32
    %15 = vector.broadcast %cst_9 : f32 to vector<64x128xf32>
    %16 = arith.addf %15, %14 : vector<64x128xf32>
    %17 = arith.divf %15, %16 : vector<64x128xf32>
    %18 = arith.mulf %17, %11 : vector<64x128xf32>
    %cst_10 = arith.constant 1.000000e+00 : f32
    %19 = vector.broadcast %cst_10 : f32 to vector<64x128xf32>
    %20 = arith.subf %19, %17 : vector<64x128xf32>
    %21 = arith.mulf %20, %2 : vector<64x128xf32>
    %22 = arith.addf %18, %21 : vector<64x128xf32>
    %23 = arith.truncf %22 : vector<64x128xf32> to vector<64x128xbf16>
    %c0_11 = arith.constant 0 : index
    %c0_12 = arith.constant 0 : index
    %24 = vector.load %arg5[%c0_11, %c0_12] : memref<128x256xbf16, #tpu.memory_space<vmem>>, vector<128x256xbf16>
    %cst_13 = arith.constant dense<0.000000e+00> : vector<64x256xf32>
    %25 = tpu.matmul %23, %24, %cst_13 {dimension_numbers = #tpu.dot_dimension_numbers<[1], [0], [0], [1], [0, 0, 1, 1], [], []>} : vector<64x128xbf16>, vector<128x256xbf16>, vector<64x256xf32> -> vector<64x256xf32>
    %c0_14 = arith.constant 0 : index
    %c0_15 = arith.constant 0 : index
    %26 = vector.load %arg6[%c0_14, %c0_15] : memref<1x256xf32, #tpu.memory_space<vmem>>, vector<1x256xf32>
    %27 = vector.broadcast %26 : vector<1x256xf32> to vector<64x256xf32>
    %28 = arith.addf %25, %27 : vector<64x256xf32>
    %29 = vector.extract_strided_slice %28 {offsets = [0, 0], sizes = [64, 128], strides = [1, 1]} : vector<64x256xf32> to vector<64x128xf32>
    %cst_16 = arith.constant 0.000000e+00 : f32
    %30 = vector.broadcast %cst_16 : f32 to vector<64x128xf32>
    %31 = arith.maximumf %29, %30 : vector<64x128xf32>
    %32 = vector.extract_strided_slice %28 {offsets = [0, 128], sizes = [64, 128], strides = [1, 1]} : vector<64x256xf32> to vector<64x128xf32>
    %33 = arith.negf %32 : vector<64x128xf32>
    %34 = math.exp %33 : vector<64x128xf32>
    %cst_17 = arith.constant 1.000000e+00 : f32
    %35 = vector.broadcast %cst_17 : f32 to vector<64x128xf32>
    %36 = arith.addf %35, %34 : vector<64x128xf32>
    %37 = arith.divf %35, %36 : vector<64x128xf32>
    %38 = arith.mulf %37, %31 : vector<64x128xf32>
    %cst_18 = arith.constant 1.000000e+00 : f32
    %39 = vector.broadcast %cst_18 : f32 to vector<64x128xf32>
    %40 = arith.subf %39, %37 : vector<64x128xf32>
    %41 = arith.mulf %40, %22 : vector<64x128xf32>
    %42 = arith.addf %38, %41 : vector<64x128xf32>
    %43 = arith.truncf %42 : vector<64x128xf32> to vector<64x128xbf16>
    %c0_19 = arith.constant 0 : index
    %c0_20 = arith.constant 0 : index
    %44 = vector.load %arg7[%c0_19, %c0_20] : memref<128x1024xbf16, #tpu.memory_space<vmem>>, vector<128x1024xbf16>
    %cst_21 = arith.constant dense<0.000000e+00> : vector<64x1024xf32>
    %45 = tpu.matmul %43, %44, %cst_21 {dimension_numbers = #tpu.dot_dimension_numbers<[1], [0], [0], [1], [0, 0, 1, 1], [], []>} : vector<64x128xbf16>, vector<128x1024xbf16>, vector<64x1024xf32> -> vector<64x1024xf32>
    %c0_22 = arith.constant 0 : index
    %c0_23 = arith.constant 0 : index
    %46 = vector.load %arg8[%c0_22, %c0_23] : memref<1x1024xf32, #tpu.memory_space<vmem>>, vector<1x1024xf32>
    %47 = vector.broadcast %46 : vector<1x1024xf32> to vector<64x1024xf32>
    %48 = arith.addf %45, %47 : vector<64x1024xf32>
    %c0_24 = arith.constant 0 : index
    %c0_25 = arith.constant 0 : index
    %49 = vector.load %arg9[%c0_24, %c0_25] : memref<64x1024xf32, #tpu.memory_space<vmem>>, vector<64x1024xf32>
    tpu.vector_store %arg9[%c0_24, %c0_25], %48 {strides = array<i32>} : memref<64x1024xf32, #tpu.memory_space<vmem>>, vector<64x1024xf32>,
    return
  }
  func.func @transform_0(%arg0: i32) -> (i32, i32) {
    %c0_i32 = arith.constant 0 : i32
    %c0_i32_0 = arith.constant 0 : i32
    return %arg0, %c0_i32 : i32, i32
  }
  func.func @transform_1(%arg0: i32) -> (i32, i32) {
    %c0_i32 = arith.constant 0 : i32
    %c0_i32_0 = arith.constant 0 : i32
    %c0_i32_1 = arith.constant 0 : i32
    return %c0_i32, %c0_i32_0 : i32, i32
  }
  func.func @transform_2(%arg0: i32) -> (i32, i32) {
    %c0_i32 = arith.constant 0 : i32
    %c0_i32_0 = arith.constant 0 : i32
    %c0_i32_1 = arith.constant 0 : i32
    return %c0_i32, %c0_i32_0 : i32, i32
  }
  func.func @transform_3(%arg0: i32) -> (i32, i32) {
    %c0_i32 = arith.constant 0 : i32
    %c0_i32_0 = arith.constant 0 : i32
    %c0_i32_1 = arith.constant 0 : i32
    return %c0_i32, %c0_i32_0 : i32, i32
  }
  func.func @transform_4(%arg0: i32) -> (i32, i32) {
    %c0_i32 = arith.constant 0 : i32
    %c0_i32_0 = arith.constant 0 : i32
    %c0_i32_1 = arith.constant 0 : i32
    return %c0_i32, %c0_i32_0 : i32, i32
  }
  func.func @transform_5(%arg0: i32) -> (i32, i32) {
    %c0_i32 = arith.constant 0 : i32
    %c0_i32_0 = arith.constant 0 : i32
    %c0_i32_1 = arith.constant 0 : i32
    return %c0_i32, %c0_i32_0 : i32, i32
  }
  func.func @transform_6(%arg0: i32) -> (i32, i32) {
    %c0_i32 = arith.constant 0 : i32
    %c0_i32_0 = arith.constant 0 : i32
    %c0_i32_1 = arith.constant 0 : i32
    return %c0_i32, %c0_i32_0 : i32, i32
  }
  func.func @transform_7(%arg0: i32) -> (i32, i32) {
    %c0_i32 = arith.constant 0 : i32
    %c0_i32_0 = arith.constant 0 : i32
    %c0_i32_1 = arith.constant 0 : i32
    return %c0_i32, %c0_i32_0 : i32, i32
  }
  func.func @transform_8(%arg0: i32) -> (i32, i32) {
    %c0_i32 = arith.constant 0 : i32
    %c0_i32_0 = arith.constant 0 : i32
    return %arg0, %c0_i32 : i32, i32
  }
}

</mosaic_0001>

<bundles_post_ra>
// kernel: tpu_custom_call.1
= control target key start
LH: loop header
LB: loop body
LE: loop exit
PB: predicated region body
PF: predicated region fallthrough
CT: control target
= control target key end

     0   :  { %13 = vsyncpa [#allocation3], 0  ;;  %s2468_s0 = inlined_call_operand.hbm [shape: bf16[64,128], index: 0, kind: input, shape index: {}]   ;;  %s2469_s1 = inlined_call_operand.hbm [shape: bf16[128,128], index: 1, kind: input, shape index: {}]   ;;  %s2470_s2 = inlined_call_operand.hbm [shape: bf16[128,256], index: 2, kind: input, shape index: {}]   ;;  %s2471_s3 = inlined_call_operand.vmem [shape: f32[1,256], index: 3, kind: input, shape index: {}]   ;;  %s2472_s4 = inlined_call_operand.hbm [shape: bf16[128,256], index: 4, kind: input, shape index: {}]   ;;  %s2473_s5 = inlined_call_operand.vmem [shape: f32[1,256], index: 5, kind: input, shape index: {}]   ;;  %s2474_s6 = inlined_call_operand.hbm [shape: bf16[128,1024], index: 6, kind: input, shape index: {}]   ;;  %s2475_s7 = inlined_call_operand.vmem [shape: f32[1,1024], index: 7, kind: input, shape index: {}]   ;;  %s2476_s8 = inlined_call_operand.hbm [shape: f32[64,1024], index: 8, kind: output, shape index: {}]  }
   0x1   :  { %14 = vsyncpa [#allocation6], 0 }
   0x2   :  { %15 = vsyncpa [#allocation9], 0 }
   0x3   :  { %16 = vsyncpa [#allocation4], 0  ;;  %s2053_s27 = smov [#allocation5]  }
   0x4   :  { %s34_s28 = sshll.u32 %s2053_s27, 4  ;;  %s35_s28 = int_to_ptr.vmem [resolvable:$true] %s34_s28 }
   0x5   :  { %s1933_s29 = scalar_lea.vmem %s35_s28, 1024  ;;  %p1938_p1 = scmp.lt.s32.totalorder %s35_s28, %s35_s28 }
   0x6   :  { %p1934_p0 = scmp.ne.s32.totalorder %s35_s28, %s1933_s29  ;;  %p1939_p2 = scmp.lt.s32.totalorder %s1933_s29, %s1933_s29 }
   0x8   :  { %p1940_p3 = por %p1939_p2, %p1938_p1 }
   0xa   :  { %p1941_p4 = pnand %p1940_p3, %p1934_p0 }
   0xc   :  { %1944 = shalt.err (!%p1941_p4)
}
   0xd   :  { %s2054_s30 = smov 64   ;;  %s2055_s9 = smov 4  }
   0xe   :  { %40 = dma.hbm_to_vmem [thread:$0]  %s2469_s1, 1024, %s35_s28, [#allocation6], %s2054_s30, %s2054_s30, %s2055_s9  }
   0xf   :  { %s2056_s12 = smov [#allocation8]   ;;  %s2057_s14 = smov [#allocation2]  }
  0x10   :  { %s60_s13 = sshll.u32 %s2056_s12, 4  ;;  %s22_s15 = sshll.u32 %s2057_s14, 4  ;;  %s61_s13 = int_to_ptr.vmem [resolvable:$true] %s60_s13  ;;  %s23_s15 = int_to_ptr.vmem [resolvable:$true] %s22_s15 }
  0x11   :  { %s1953_s16 = scalar_lea.vmem %s61_s13, 2048  ;;  %p1958_p6 = scmp.lt.s32.totalorder %s61_s13, %s61_s13 }
  0x12   :  { %p1954_p5 = scmp.ne.s32.totalorder %s61_s13, %s1953_s16  ;;  %p1959_p7 = scmp.lt.s32.totalorder %s1953_s16, %s1953_s16 }
  0x14   :  { %p1960_p8 = por %p1959_p7, %p1958_p6 }
  0x16   :  { %p1961_p9 = pnand %p1960_p8, %p1954_p5 }
  0x18   :  { %1964 = shalt.err (!%p1961_p9)
}
  0x19   :  { %s2058_s17 = smov 128   ;;  %s2059_s18 = smov 8  }
  0x1a   :  { %66 = dma.hbm_to_vmem [thread:$0]  %s2472_s4, 2048, %s61_s13, [#allocation9], %s2058_s17, %s2058_s17, %s2059_s18  }
  0x1b   :  { %s1973_s1 = scalar_lea.vmem %s23_s15, 512  ;;  %p1978_p11 = scmp.lt.s32.totalorder %s23_s15, %s23_s15 }
  0x1c   :  { %p1974_p10 = scmp.ne.s32.totalorder %s23_s15, %s1973_s1  ;;  %p1979_p12 = scmp.lt.s32.totalorder %s1973_s1, %s1973_s1 }
  0x1e   :  { %p1980_p13 = por %p1979_p12, %p1978_p11 }
  0x20   :  { %p1981_p0 = pnand %p1980_p13, %p1974_p10 }
  0x22   :  { %1984 = shalt.err (!%p1981_p0)
}
  0x23   :  { %28 = dma.hbm_to_vmem [thread:$0]  %s2468_s0, 512, %s23_s15, [#allocation3], %s2054_s30, %s2054_s30, %s2055_s9  }
  0x24   :  { %s2060_s23 = smov [#allocation7]   ;;  %s2061_s25 = smov [#allocation10]  }
  0x25   :  { %s46_s24 = sshll.u32 %s2060_s23, 4  ;;  %s74_s26 = sshll.u32 %s2061_s25, 4  ;;  %s47_s24 = int_to_ptr.vmem [resolvable:$true] %s46_s24  ;;  %s75_s26 = int_to_ptr.vmem [resolvable:$true] %s74_s26 }
  0x26   :  { %s1993_s4 = scalar_lea.vmem %s47_s24, 2048  ;;  %p1998_p2 = scmp.lt.s32.totalorder %s47_s24, %s47_s24 }
  0x27   :  { %p1994_p1 = scmp.ne.s32.totalorder %s47_s24, %s1993_s4  ;;  %p1999_p3 = scmp.lt.s32.totalorder %s1993_s4, %s1993_s4 }
  0x29   :  { %p2000_p4 = por %p1999_p3, %p1998_p2 }
  0x2b   :  { %p2001_p5 = pnand %p2000_p4, %p1994_p1 }
  0x2d   :  { %2004 = shalt.err (!%p2001_p5)
}
  0x2e   :  { %52 = dma.hbm_to_vmem [thread:$0]  %s2470_s2, 2048, %s47_s24, [#allocation6], %s2058_s17, %s2058_s17, %s2059_s18  }
  0x2f   :  { %s2013_s29 = scalar_lea.vmem %s75_s26, 8192  ;;  %p2018_p7 = scmp.lt.s32.totalorder %s75_s26, %s75_s26 }
  0x30   :  { %p2014_p6 = scmp.ne.s32.totalorder %s75_s26, %s2013_s29  ;;  %p2019_p8 = scmp.lt.s32.totalorder %s2013_s29, %s2013_s29 }
  0x32   :  { %p2020_p9 = por %p2019_p8, %p2018_p7 }
  0x34   :  { %p2021_p10 = pnand %p2020_p9, %p2014_p6 }
  0x36   :  { %2024 = shalt.err (!%p2021_p10)
}
  0x37   :  { %s2062_s0 = smov 512   ;;  %s2063_s9 = smov 32  }
  0x38   :  { %80 = dma.hbm_to_vmem [thread:$0]  %s2474_s6, 8192, %s75_s26, [#allocation9], %s2062_s0, %s2062_s0, %s2063_s9  }
  0x39   :  { %2045 = dma.done.wait [#allocation3], 512  }
  0x3a   :  { %2046 = vsyncadd [#allocation3], 4294966784 }
  0x3b   :  { %2047 = dma.done.wait [#allocation6], 3072  }
  0x3c   :  { %2048 = vsyncadd [#allocation6], 4294964224 }
  0x3d   :  { %2049 = dma.done.wait [#allocation9], 10240  }
  0x3e   :  { %2050 = vsyncadd [#allocation9], 4294957056  ;;  %v1801_v0 = vld [vmem:[#allocation5 + $0x38] sm:$0xff]   ;;  %v1802_v1 = vld [vmem:[#allocation5 + $0x30] sm:$0xff]   ;;  %v2064_v28 = vmov 0   ;;  %v282_v57 = vlaneseq }
  0x3f   :  { %1747 = vmatprep.subr.bf16.mxu0 %v1801_v0  ;;  %v1803_v2 = vld [vmem:[#allocation5 + $0x28] sm:$0xff]   ;;  %v1804_v3 = vld [vmem:[#allocation5 + $0x20] sm:$0xff]   ;;  %v1805_v5 = vld [vmem:[#allocation5 + $0x18] sm:$0xff]   ;;  %404 = vmatprep.mubr.bf16.mxu1 %v2064_v28 }
  0x40   :  { %1748 = vmatpush3.bf16.msra.mxu0 %v1801_v0  ;;  %v1809_v4 = vld [vmem:[#allocation2] sm:$0xff]   ;;  %v1813_v6 = vld [vmem:[#allocation7 + $0x74] ss:$8 sps:$4 sm:$0xff]   ;;  %v1815_v7 = vld [vmem:[#allocation7 + $0x70] ss:$8 sps:$4 sm:$0xff]   ;;  %v2161_v58 = vshrl.u32 %v282_v57, 7 }
  0x41   :  { %1749 = vmatprep.subr.bf16.mxu0 %v1802_v1  ;;  %1763 = vmatprep.mubr.bf16.mxu0 %v1809_v4  ;;  %v1816_v8 = vld [vmem:[#allocation7 + $0x64] ss:$8 sps:$4 sm:$0xff]   ;;  %v1806_v9 = vld [vmem:[#allocation5 + $0x10] sm:$0xff]   ;;  %v1818_v10 = vld [vmem:[#allocation7 + $0x60] ss:$8 sps:$4 sm:$0xff]  }
  0x42   :  { %372 = vmatprep.subr.bf16.mxu1 %v1813_v6  ;;  %v1819_v11 = vld [vmem:[#allocation7 + $0x54] ss:$8 sps:$4 sm:$0xff]   ;;  %v1807_v12 = vld [vmem:[#allocation5 + $0x8] sm:$0xff]   ;;  %v1821_v13 = vld [vmem:[#allocation7 + $0x50] ss:$8 sps:$4 sm:$0xff]   ;;  %v2164_v59 = vsub.s32 1, %v2161_v58 }
  0x43   :  { %373 = vmatpush1.bf16.msra.mxu1 %v1815_v7  ;;  %v1822_v14 = vld [vmem:[#allocation7 + $0x44] ss:$8 sps:$4 sm:$0xff]   ;;  %v1824_v15 = vld [vmem:[#allocation7 + $0x40] ss:$8 sps:$4 sm:$0xff]   ;;  %v1825_v17 = vld [vmem:[#allocation7 + $0x34] ss:$8 sps:$4 sm:$0xff]  }
  0x44   :  { %1750 = vmatpush3.bf16.msra.mxu0 %v1802_v1  ;;  %374 = vmatprep.subr.bf16.mxu1 %v1816_v8  ;;  %v1808_v16 = vld [vmem:[#allocation5] sm:$0xff]   ;;  %v1827_v18 = vld [vmem:[#allocation7 + $0x30] ss:$8 sps:$4 sm:$0xff]   ;;  %v1810_v20 = vld [vmem:[#allocation2 + $0x8] sm:$0xff]  }
  0x45   :  { %1751 = vmatprep.subr.bf16.mxu0 %v1803_v2  ;;  %v1828_v19 = vld [vmem:[#allocation7 + $0x24] ss:$8 sps:$4 sm:$0xff]   ;;  %v1811_v21 = vld [vmem:[#allocation2 + $0x10] sm:$0xff]   ;;  %v1830_v22 = vld [vmem:[#allocation7 + $0x20] ss:$8 sps:$4 sm:$0xff]  }
  0x46   :  { %v1812_v23 = vld [vmem:[#allocation2 + $0x18] sm:$0xff]   ;;  %v1834_v26 = vld [vmem:[#allocation7 + $0x4] ss:$8 sps:$4 sm:$0xff]   ;;  %v1836_v27 = vld [vmem:[#allocation7] ss:$8 sps:$4 sm:$0xff]  }
  0x47   :  { %375 = vmatpush1.bf16.msra.mxu1 %v1818_v10  ;;  %v1831_v24 = vld [vmem:[#allocation7 + $0x14] ss:$8 sps:$4 sm:$0xff]   ;;  %v1833_v25 = vld [vmem:[#allocation7 + $0x10] ss:$8 sps:$4 sm:$0xff]   ;;  %v1842_v43 = vld [vmem:[#allocation8 + $0x64] ss:$8 sps:$4 sm:$0xff]  }
  0x48   :  { %1752 = vmatpush3.bf16.msra.mxu0 %v1803_v2  ;;  %376 = vmatprep.subr.bf16.mxu1 %v1819_v11  ;;  %v1839_v41 = vld [vmem:[#allocation8 + $0x74] ss:$8 sps:$4 sm:$0xff]   ;;  %v1837_v42 = vld [vmem:[#allocation8 + $0x70] ss:$8 sps:$4 sm:$0xff]   ;;  %v1840_v44 = vld [vmem:[#allocation8 + $0x60] ss:$8 sps:$4 sm:$0xff]  }
  0x49   :  { %1753 = vmatprep.subr.bf16.mxu0 %v1804_v3  ;;  %v1845_v45 = vld [vmem:[#allocation8 + $0x54] ss:$8 sps:$4 sm:$0xff]   ;;  %v1843_v46 = vld [vmem:[#allocation8 + $0x50] ss:$8 sps:$4 sm:$0xff]   ;;  %v1848_v47 = vld [vmem:[#allocation8 + $0x44] ss:$8 sps:$4 sm:$0xff]  }
  0x4a   :  { %v1846_v48 = vld [vmem:[#allocation8 + $0x40] ss:$8 sps:$4 sm:$0xff]   ;;  %v1851_v49 = vld [vmem:[#allocation8 + $0x34] ss:$8 sps:$4 sm:$0xff]   ;;  %v1849_v50 = vld [vmem:[#allocation8 + $0x30] ss:$8 sps:$4 sm:$0xff]  }
  0x4b   :  { %377 = vmatpush1.bf16.msra.mxu1 %v1821_v13  ;;  %v1854_v51 = vld [vmem:[#allocation8 + $0x24] ss:$8 sps:$4 sm:$0xff]   ;;  %v1852_v52 = vld [vmem:[#allocation8 + $0x20] ss:$8 sps:$4 sm:$0xff]   ;;  %v1857_v53 = vld [vmem:[#allocation8 + $0x14] ss:$8 sps:$4 sm:$0xff]  }
  0x4c   :  { %1754 = vmatpush3.bf16.msra.mxu0 %v1804_v3  ;;  %378 = vmatprep.subr.bf16.mxu1 %v1822_v14  ;;  %v1855_v54 = vld [vmem:[#allocation8 + $0x10] ss:$8 sps:$4 sm:$0xff]   ;;  %v1860_v55 = vld [vmem:[#allocation8 + $0x4] ss:$8 sps:$4 sm:$0xff]   ;;  %v1858_v56 = vld [vmem:[#allocation8] ss:$8 sps:$4 sm:$0xff]  }
  0x4d   :  { %1755 = vmatprep.subr.bf16.mxu0 %v1805_v5  ;;  %v280_v60 = vld [vmem:[%s2471_s3] sm:$0x3] }
  0x4e   :  { %v289_v61 = vrot.slane %v280_v60, %v2164_v59 }
  0x4f   :  { %379 = vmatpush1.bf16.msra.mxu1 %v1824_v15 }
  0x50   :  { %1756 = vmatpush3.bf16.msra.mxu0 %v1805_v5  ;;  %380 = vmatprep.subr.bf16.mxu1 %v1825_v17 }
  0x51   :  { %1757 = vmatprep.subr.bf16.mxu0 %v1806_v9 }
  0x53   :  { %381 = vmatpush1.bf16.msra.mxu1 %v1827_v18 }
  0x54   :  { %1758 = vmatpush3.bf16.msra.mxu0 %v1806_v9  ;;  %382 = vmatprep.subr.bf16.mxu1 %v1828_v19 }
  0x55   :  { %1759 = vmatprep.subr.bf16.mxu0 %v1807_v12 }
  0x57   :  { %383 = vmatpush1.bf16.msra.mxu1 %v1830_v22 }
  0x58   :  { %1760 = vmatpush3.bf16.msra.mxu0 %v1807_v12  ;;  %384 = vmatprep.subr.bf16.mxu1 %v1831_v24 }
  0x59   :  { %1761 = vmatprep.subr.bf16.mxu0 %v1808_v16 }
  0x5b   :  { %385 = vmatpush1.bf16.msra.mxu1 %v1833_v25 }
  0x5c   :  { %1762 = vmatpush3.bf16.msra.mxu0 %v1808_v16  ;;  %386 = vmatprep.subr.bf16.mxu1 %v1834_v26 }
  0x5d   :  { %645 = vmatprep.subr.bf16.mxu0 %v1839_v41 }
  0x5f   :  { %1764 = vmatmul.mubr.bf16.vlgmr.msra.gmra.mxu0 %v1810_v20  ;;  %387 = vmatpush1.bf16.msra.mxu1 %v1836_v27 }
  0x60   :  { %1767 = vmatprep.mubr.bf16.mxu0 %v1811_v21  ;;  %646 = vmatpush1.bf16.msra.mxu0 %v1837_v42 }
  0x61   :  { %647 = vmatprep.subr.bf16.mxu0 %v1842_v43 }
  0x64   :  { %648 = vmatpush1.bf16.msra.mxu0 %v1840_v44 }
  0x65   :  { %649 = vmatprep.subr.bf16.mxu0 %v1845_v45 }
  0x67   :  { %1768 = vmatmul.mubr.bf16.gmra.mxu0 %v1812_v23 }
  0x68   :  { %677 = vmatprep.mubr.bf16.mxu0 %v2064_v28  ;;  %650 = vmatpush1.bf16.msra.mxu0 %v1843_v46 }
  0x69   :  { %651 = vmatprep.subr.bf16.mxu0 %v1848_v47 }
  0x6c   :  { %652 = vmatpush1.bf16.msra.mxu0 %v1846_v48 }
  0x6d   :  { %653 = vmatprep.subr.bf16.mxu0 %v1851_v49 }
  0x70   :  { %654 = vmatpush1.bf16.msra.mxu0 %v1849_v50 }
  0x71   :  { %655 = vmatprep.subr.bf16.mxu0 %v1854_v51 }
  0x74   :  { %656 = vmatpush1.bf16.msra.mxu0 %v1852_v52 }
  0x75   :  { %657 = vmatprep.subr.bf16.mxu0 %v1857_v53 }
  0x78   :  { %658 = vmatpush1.bf16.msra.mxu0 %v1855_v54 }
  0x79   :  { %659 = vmatprep.subr.bf16.mxu0 %v1860_v55 }
  0x7c   :  { %660 = vmatpush1.bf16.msra.mxu0 %v1858_v56 }
 0x11f   :  { %v2133_v29 = vpop.f32.mrf.mxu0 }
 0x121   :  { %v2135_v30 = vpop.f32.mrf.mxu0 }
 0x123   :  { %v2137_v31 = vpop.f32.mrf.mxu0 }
 0x124   :  { %v261_v36 = vpack.c.bf16 %v2137_v31, %v2133_v29 }
 0x125   :  { %v2139_v32 = vpop.f32.mrf.mxu0 }
 0x126   :  { %v260_v33 = vpack.c.bf16 %v2139_v32, %v2135_v30 }
 0x127   :  { %v2143_v34 = vpop.f32.mrf.mxu0 }
 0x128   :  { %405 = vmatmul.mubr.bf16.vlgmr.msra.gmra.mxu1 %v260_v33 }
 0x129   :  { %414 = vmatprep.mubr.bf16.mxu1 %v2064_v28  ;;  %v2146_v35 = vpop.f32.mrf.mxu0 }
 0x12b   :  { %v2150_v37 = vpop.f32.mrf.mxu0 }
 0x12c   :  { %v263_v40 = vpack.c.bf16 %v2150_v37, %v2143_v34 }
 0x12d   :  { %v2153_v38 = vpop.f32.mrf.mxu0 }
 0x12e   :  { %v262_v39 = vpack.c.bf16 %v2153_v38, %v2146_v35 }
 0x130   :  { %415 = vmatmul.mubr.bf16.gmra.mxu1 %v261_v36 }
 0x131   :  { %424 = vmatprep.mubr.bf16.mxu1 %v2064_v28 }
 0x138   :  { %425 = vmatmul.mubr.bf16.gmra.mxu1 %v262_v39 }
 0x139   :  { %434 = vmatprep.mubr.bf16.mxu1 %v2064_v28 }
 0x140   :  { %435 = vmatmul.mubr.bf16.gmra.mxu1 %v263_v40  ;;  %v2181_v40 = vsub.s32 0, %v2161_v58 }
 0x141   :  { %1268 = vmatprep.mubr.bf16.mxu1 %v2064_v28 }
 0x142   :  { %v2184_v46 = vrot.slane %v280_v60, %v2181_v40 }
 0x1e8   :  { %v406_v62 = vpop.f32.mrf.mxu1 }
 0x1e9   :  { %v407_v51 = vadd.f32 %v406_v62, %v2184_v46 }
 0x1ea   :  { %v408_v63 = vpop.f32.mrf.mxu1 }
 0x1eb   :  { %v409_v0 = vadd.f32 %v408_v63, %v289_v61  ;;  %v445_v57 = vmax.f32 %v407_v51, 0.0 }
 0x1ec   :  { %v410_v1 = vpop.f32.mrf.mxu1 }
 0x1ed   :  { %v1639_v2 = vmul.f32 -1.442695, %v409_v0  ;;  %v411_v52 = vadd.f32 %v410_v1, %v2184_v46 }
 0x1ee   :  { %v412_v3 = vpop.f32.mrf.mxu1 }
 0x1ef   :  { %1861 = vpow2.f32 %v1639_v2  ;;  %v413_v4 = vadd.f32 %v412_v3, %v289_v61 }
 0x1f0   :  { %v2170_v5 = vpop.f32.mrf.mxu1 }
 0x1f1   :  { %v1640_v6 = vmul.f32 -1.442695, %v413_v4  ;;  %v417_v62 = vadd.f32 %v2170_v5, %v2184_v46 }
 0x1f2   :  { %v418_v7 = vpop.f32.mrf.mxu1 }
 0x1f3   :  { %1863 = vpow2.f32 %v1640_v6  ;;  %v419_v8 = vadd.f32 %v418_v7, %v289_v61 }
 0x1f4   :  { %v420_v9 = vpop.f32.mrf.mxu1 }
 0x1f5   :  { %v1641_v10 = vmul.f32 -1.442695, %v419_v8  ;;  %v421_v7 = vadd.f32 %v420_v9, %v2184_v46 }
 0x1f6   :  { %v422_v11 = vpop.f32.mrf.mxu1 }
 0x1f7   :  { %1865 = vpow2.f32 %v1641_v10  ;;  %v423_v12 = vadd.f32 %v422_v11, %v289_v61 }
 0x1f8   :  { %v2172_v13 = vpop.f32.mrf.mxu1 }
 0x1f9   :  { %v1642_v14 = vmul.f32 -1.442695, %v423_v12 }
 0x1fa   :  { %v428_v15 = vpop.f32.mrf.mxu1 }
 0x1fb   :  { %1867 = vpow2.f32 %v1642_v14  ;;  %v429_v16 = vadd.f32 %v428_v15, %v289_v61  ;;  %v447_v15 = vmax.f32 %v417_v62, 0.0  ;;  %v862_v62 = vld [vmem:[#allocation10 + $0x1a0] sm:$0xff] }
 0x1fc   :  { %v1862_v17 = vpop.eup %1861  ;;  %v2174_v18 = vpop.f32.mrf.mxu1 }
 0x1fd   :  { %v477_v19 = vadd.f32 1.0, %v1862_v17  ;;  %v1643_v20 = vmul.f32 -1.442695, %v429_v16  ;;  %v448_v16 = vmax.f32 %v421_v7, 0.0 }
 0x1fe   :  { %v432_v21 = vpop.f32.mrf.mxu1 }
 0x1ff   :  { %1869 = vrcp.f32 %v477_v19  ;;  %v433_v22 = vadd.f32 %v432_v21, %v289_v61 }
 0x200   :  { %v1864_v23 = vpop.eup %1863  ;;  %1871 = vpow2.f32 %v1643_v20  ;;  %v2176_v24 = vpop.f32.mrf.mxu1 }
 0x201   :  { %v478_v25 = vadd.f32 1.0, %v1864_v23  ;;  %v1644_v26 = vmul.f32 -1.442695, %v433_v22 }
 0x202   :  { %v438_v27 = vpop.f32.mrf.mxu1 }
 0x203   :  { %1873 = vrcp.f32 %v478_v25  ;;  %v439_v33 = vadd.f32 %v438_v27, %v289_v61  ;;  %v431_v27 = vadd.f32 %v2174_v18, %v2184_v46  ;;  %v437_v18 = vadd.f32 %v2176_v24, %v2184_v46 }
 0x204   :  { %v1866_v36 = vpop.eup %1865  ;;  %1875 = vpow2.f32 %v1644_v26  ;;  %v2178_v39 = vpop.f32.mrf.mxu1  ;;  %v427_v26 = vadd.f32 %v2172_v13, %v2184_v46 }
 0x205   :  { %v479_v41 = vadd.f32 1.0, %v1866_v36  ;;  %v1645_v42 = vmul.f32 -1.442695, %v439_v33 }
 0x206   :  { %v442_v43 = vpop.f32.mrf.mxu1 }
 0x207   :  { %1877 = vrcp.f32 %v479_v41  ;;  %v443_v44 = vadd.f32 %v442_v43, %v289_v61  ;;  %v446_v61 = vmax.f32 %v411_v52, 0.0  ;;  %v449_v41 = vmax.f32 %v427_v26, 0.0  ;;  %v843_v26 = vld [vmem:[#allocation10 + $0x108] sm:$0xff] }
 0x208   :  { %v1868_v45 = vpop.eup %1867  ;;  %1879 = vpow2.f32 %v1645_v42 }
 0x209   :  { %v480_v47 = vadd.f32 1.0, %v1868_v45  ;;  %v1646_v48 = vmul.f32 -1.442695, %v443_v44 }
 0x20b   :  { %1881 = vrcp.f32 %v480_v47 }
 0x20c   :  { %v1870_v49 = vpop.eup %1869  ;;  %1883 = vpow2.f32 %v1646_v48  ;;  %v441_v48 = vadd.f32 %v2178_v39, %v2184_v46 }
 0x20d   :  { %v1872_v50 = vpop.eup %1871  ;;  %v509_v53 = vsub.f32 1.0, %v1870_v49  ;;  %v501_v2 = vmul.f32 %v1870_v49, %v445_v57 }
 0x20e   :  { %v481_v54 = vadd.f32 1.0, %v1872_v50 }
 0x20f   :  { %v517_v60 = vmul.f32 %v509_v53, %v2135_v30  ;;  %v451_v53 = vmax.f32 %v437_v18, 0.0 }
 0x210   :  { %v1874_v55 = vpop.eup %1873  ;;  %1885 = vrcp.f32 %v481_v54  ;;  %v452_v54 = vmax.f32 %v441_v48, 0.0  ;;  %v826_v48 = vld [vmem:[#allocation10 + $0x80] sm:$0xff] }
 0x211   :  { %v1876_v56 = vpop.eup %1875  ;;  %v510_v63 = vsub.f32 1.0, %v1874_v55  ;;  %v502_v3 = vmul.f32 %v1874_v55, %v446_v61  ;;  %v2193_v8 = vadd.f32 %v517_v60, %v501_v2  ;;  %v870_v60 = vld [vmem:[#allocation10 + $0x1e0] sm:$0xff]  ;;  %v871_v2 = vld [vmem:[#allocation10 + $0x1e8] sm:$0xff] }
 0x212   :  { %v482_v0 = vadd.f32 1.0, %v1876_v56 }
 0x213   :  { %v518_v4 = vmul.f32 %v510_v63, %v2139_v32  ;;  %v866_v63 = vld [vmem:[#allocation10 + $0x1c0] sm:$0xff] }
 0x214   :  { %v1878_v6 = vpop.eup %1877  ;;  %1887 = vrcp.f32 %v482_v0  ;;  %v867_v0 = vld [vmem:[#allocation10 + $0x1c8] sm:$0xff] }
 0x215   :  { %v1880_v1 = vpop.eup %1879  ;;  %v2195_v10 = vadd.f32 %v518_v4, %v502_v3  ;;  %v511_v11 = vsub.f32 1.0, %v1878_v6  ;;  %v503_v9 = vmul.f32 %v1878_v6, %v447_v15  ;;  %v1727_v3 = vcombine.low %v866_v63, %v870_v60  ;;  %v854_v15 = vld [vmem:[#allocation10 + $0x160] sm:$0xff] }
 0x216   :  { %v483_v12 = vadd.f32 1.0, %v1880_v1  ;;  %v1729_v4 = vcombine.low %v867_v0, %v871_v2  ;;  %v1730_v6 = vcombine.high %v867_v0, %v871_v2  ;;  %v859_v1 = vld [vmem:[#allocation10 + $0x188] sm:$0xff]  ;;  %v810_v2 = vld [vmem:[#allocation10] sm:$0xff] }
 0x217   :  { %v533_v30 = vpack.c.bf16 %v2195_v10, %v2193_v8  ;;  %v519_v17 = vmul.f32 %v2133_v29, %v511_v11  ;;  %v863_v11 = vld [vmem:[#allocation10 + $0x1a8] sm:$0xff] }
 0x218   :  { %v1882_v14 = vpop.eup %1881  ;;  %1889 = vrcp.f32 %v483_v12  ;;  %1309 = vmatprep.subr.bf16.mxu0 %v1730_v6 }
 0x219   :  { %v1884_v32 = vpop.eup %1883  ;;  %678 = vmatmul.mubr.bf16.vlgmr.msra.gmra.mxu0 %v533_v30  ;;  %v512_v5 = vsub.f32 1.0, %v1882_v14  ;;  %v504_v20 = vmul.f32 %v1882_v14, %v448_v16  ;;  %v2202_v23 = vadd.f32 %v519_v17, %v503_v9  ;;  %v1721_v30 = vcombine.low %v859_v1, %v863_v11  ;;  %v851_v16 = vld [vmem:[#allocation10 + $0x148] sm:$0xff] }
 0x21a   :  { %v484_v19 = vadd.f32 1.0, %v1884_v32  ;;  %687 = vmatprep.mubr.bf16.mxu0 %v2064_v28  ;;  %1310 = vmatpush1.bf16.msra.mxu0 %v1729_v4  ;;  %v1722_v14 = vcombine.high %v859_v1, %v863_v11  ;;  %v850_v32 = vld [vmem:[#allocation10 + $0x140] sm:$0xff]  ;;  %v855_v17 = vld [vmem:[#allocation10 + $0x168] sm:$0xff]  ;;  %v2235_v11 = vld [vmem:[#allocation10 + $0x1d0] sm:$0xff] }
 0x21b   :  { %v520_v21 = vmul.f32 %v2137_v31, %v512_v5  ;;  %v450_v31 = vmax.f32 %v431_v27, 0.0  ;;  %v1712_v5 = vcombine.high %v850_v32, %v854_v15  ;;  %v1713_v9 = vcombine.low %v851_v16, %v855_v17  ;;  %v811_v4 = vld [vmem:[#allocation10 + $0x8] sm:$0xff] }
 0x21c   :  { %1891 = vrcp.f32 %v484_v19  ;;  %1311 = vmatprep.subr.bf16.mxu0 %v1722_v14  ;;  %v1711_v19 = vcombine.low %v850_v32, %v854_v15  ;;  %v873_v32 = vld [vmem:[#allocation10 + $0x1f8] sm:$0xff] }
 0x21d   :  { %v1886_v22 = vpop.eup %1885  ;;  %v2204_v25 = vadd.f32 %v520_v21, %v504_v20  ;;  %v1714_v20 = vcombine.high %v851_v16, %v855_v17  ;;  %v842_v21 = vld [vmem:[#allocation10 + $0x100] sm:$0xff] }
 0x21e   :  { %v513_v29 = vsub.f32 1.0, %v1886_v22  ;;  %v505_v44 = vmul.f32 %v1886_v22, %v449_v41  ;;  %1312 = vmatpush1.bf16.msra.mxu0 %v1721_v30  ;;  %v846_v22 = vld [vmem:[#allocation10 + $0x120] sm:$0xff]  ;;  %v869_v30 = vld [vmem:[#allocation10 + $0x1d8] sm:$0xff] }
 0x21f   :  { %v534_v33 = vpack.c.bf16 %v2204_v25, %v2202_v23  ;;  %1313 = vmatprep.subr.bf16.mxu0 %v1714_v20  ;;  %v1704_v27 = vcombine.high %v842_v21, %v846_v22  ;;  %v2243_v16 = vcombine.low %v869_v30, %v873_v32  ;;  %v553_v17 = vld [vmem:[%s2473_s5] sm:$0x3] }
 0x220   :  { %v521_v43 = vmul.f32 %v513_v29, %v2146_v35  ;;  %v847_v29 = vld [vmem:[#allocation10 + $0x128] sm:$0xff] }
 0x221   :  { %v1888_v36 = vpop.eup %1887  ;;  %688 = vmatmul.mubr.bf16.gmra.mxu0 %v534_v33  ;;  %v1703_v33 = vcombine.low %v842_v21, %v846_v22  ;;  %v1706_v41 = vcombine.high %v843_v26, %v847_v29 }
 0x222   :  { %697 = vmatprep.mubr.bf16.mxu0 %v2064_v28  ;;  %v514_v42 = vsub.f32 1.0, %v1888_v36  ;;  %v506_v45 = vmul.f32 %v1888_v36, %v450_v31  ;;  %v2219_v49 = vadd.f32 %v521_v43, %v505_v44  ;;  %1314 = vmatpush1.bf16.msra.mxu0 %v1713_v9  ;;  %v1705_v36 = vcombine.low %v843_v26, %v847_v29  ;;  %v834_v31 = vld [vmem:[#allocation10 + $0xc0] sm:$0xff]  ;;  %v835_v43 = vld [vmem:[#allocation10 + $0xc8] sm:$0xff] }
 0x223   :  { %1315 = vmatprep.subr.bf16.mxu0 %v1706_v41 }
 0x224   :  { %v522_v13 = vmul.f32 %v514_v42, %v2153_v38  ;;  %v838_v42 = vld [vmem:[#allocation10 + $0xe0] sm:$0xff] }
 0x225   :  { %v1890_v47 = vpop.eup %1889  ;;  %v1696_v44 = vcombine.high %v834_v31, %v838_v42 }
 0x226   :  { %v2221_v50 = vadd.f32 %v522_v13, %v506_v45  ;;  %v515_v51 = vsub.f32 1.0, %v1890_v47  ;;  %v507_v24 = vmul.f32 %v1890_v47, %v451_v53  ;;  %1316 = vmatpush1.bf16.msra.mxu0 %v1705_v36  ;;  %v839_v45 = vld [vmem:[#allocation10 + $0xe8] sm:$0xff]  ;;  %v1695_v13 = vcombine.low %v834_v31, %v838_v42 }
 0x227   :  { %v1697_v47 = vcombine.low %v835_v43, %v839_v45  ;;  %v1698_v18 = vcombine.high %v835_v43, %v839_v45  ;;  %v831_v53 = vld [vmem:[#allocation10 + $0xa8] sm:$0xff] }
 0x228   :  { %v535_v52 = vpack.c.bf16 %v2221_v50, %v2219_v49  ;;  %v523_v55 = vmul.f32 %v2143_v34, %v515_v51  ;;  %v1728_v34 = vcombine.high %v866_v63, %v870_v60  ;;  %v830_v51 = vld [vmem:[#allocation10 + $0xa0] sm:$0xff]  ;;  %v823_v63 = vld [vmem:[#allocation10 + $0x68] sm:$0xff] }
 0x229   :  { %v1892_v35 = vpop.eup %1891  ;;  %1317 = vmatprep.subr.bf16.mxu0 %v1698_v18 }
 0x22a   :  { %698 = vmatmul.mubr.bf16.gmra.mxu0 %v535_v52  ;;  %v516_v38 = vsub.f32 1.0, %v1892_v35  ;;  %v508_v56 = vmul.f32 %v1892_v35, %v452_v54  ;;  %v2228_v46 = vadd.f32 %v523_v55, %v507_v24  ;;  %1236 = vmatprep.subr.bf16.mxu1 %v1728_v34  ;;  %v827_v52 = vld [vmem:[#allocation10 + $0x88] sm:$0xff]  ;;  %v1688_v35 = vcombine.high %v826_v48, %v830_v51  ;;  %v818_v24 = vld [vmem:[#allocation10 + $0x40] sm:$0xff] }
 0x22b   :  { %707 = vmatprep.mubr.bf16.mxu0 %v2064_v28  ;;  %1237 = vmatpush1.bf16.msra.mxu1 %v1727_v3  ;;  %v1687_v54 = vcombine.low %v826_v48, %v830_v51  ;;  %v1690_v55 = vcombine.high %v827_v52, %v831_v53  ;;  %v814_v3 = vld [vmem:[#allocation10 + $0x20] sm:$0xff] }
 0x22c   :  { %v524_v39 = vmul.f32 %v2150_v37, %v516_v38  ;;  %v858_v37 = vld [vmem:[#allocation10 + $0x180] sm:$0xff]  ;;  %1318 = vmatpush1.bf16.msra.mxu0 %v1697_v47  ;;  %v1689_v38 = vcombine.low %v827_v52, %v831_v53  ;;  %v1672_v6 = vcombine.high %v810_v2, %v814_v3 }
 0x22d   :  { %v1720_v7 = vcombine.high %v858_v37, %v862_v62  ;;  %v1719_v12 = vcombine.low %v858_v37, %v862_v62  ;;  %1319 = vmatprep.subr.bf16.mxu0 %v1690_v55  ;;  %v815_v37 = vld [vmem:[#allocation10 + $0x28] sm:$0xff]  ;;  %v1671_v62 = vcombine.low %v810_v2, %v814_v3 }
 0x22e   :  { %v2230_v57 = vadd.f32 %v524_v39, %v508_v56  ;;  %v822_v56 = vld [vmem:[#allocation10 + $0x60] sm:$0xff]  ;;  %v819_v39 = vld [vmem:[#allocation10 + $0x48] sm:$0xff]  ;;  %v1673_v1 = vcombine.low %v811_v4, %v815_v37 }
 0x22f   :  { %1238 = vmatprep.subr.bf16.mxu1 %v1720_v7  ;;  %v1679_v60 = vcombine.low %v818_v24, %v822_v56  ;;  %v1681_v0 = vcombine.low %v819_v39, %v823_v63  ;;  %v1682_v34 = vcombine.high %v819_v39, %v823_v63  ;;  %v1674_v7 = vcombine.high %v811_v4, %v815_v37 }
 0x230   :  { %v536_v61 = vpack.c.bf16 %v2230_v57, %v2228_v46  ;;  %1239 = vmatpush1.bf16.msra.mxu1 %v1719_v12  ;;  %1320 = vmatpush1.bf16.msra.mxu0 %v1689_v38  ;;  %v2237_v12 = vld [vmem:[#allocation10 + $0x1f0] sm:$0xff]  ;;  %v2265_v37 = vrot.slane %v553_v17, %v2181_v40 }
 0x231   :  { %1240 = vmatprep.subr.bf16.mxu1 %v1712_v5  ;;  %1321 = vmatprep.subr.bf16.mxu0 %v1682_v34  ;;  %v1732_v14 = vcombine.high %v2235_v11, %v2237_v12  ;;  %v1731_v15 = vcombine.low %v2235_v11, %v2237_v12  ;;  %v2245_v5 = vcombine.high %v869_v30, %v873_v32  ;;  %v848_v11 = vld [vmem:[#allocation10 + $0x130] sm:$0xff]  ;;  %v845_v12 = vld [vmem:[#allocation10 + $0x118] sm:$0xff] }
 0x232   :  { %708 = vmatmul.mubr.bf16.gmra.mxu0 %v536_v61  ;;  %v1680_v61 = vcombine.high %v818_v24, %v822_v56 }
 0x233   :  { %1341 = vmatprep.mubr.bf16.mxu0 %v2064_v28 }
 0x234   :  { %1241 = vmatpush1.bf16.msra.mxu1 %v1711_v19  ;;  %1322 = vmatpush1.bf16.msra.mxu0 %v1681_v0  ;;  %v562_v19 = vrot.slane %v553_v17, %v2164_v59 }
 0x235   :  { %1242 = vmatprep.subr.bf16.mxu1 %v1704_v27  ;;  %1323 = vmatprep.subr.bf16.mxu0 %v1674_v7 }
 0x238   :  { %1243 = vmatpush1.bf16.msra.mxu1 %v1703_v33  ;;  %1324 = vmatpush1.bf16.msra.mxu0 %v1673_v1 }
 0x239   :  { %1244 = vmatprep.subr.bf16.mxu1 %v1696_v44  ;;  %1455 = vmatprep.subr.bf16.mxu0 %v2245_v5 }
 0x23c   :  { %1245 = vmatpush1.bf16.msra.mxu1 %v1695_v13 }
 0x23d   :  { %1246 = vmatprep.subr.bf16.mxu1 %v1688_v35 }
 0x240   :  { %1247 = vmatpush1.bf16.msra.mxu1 %v1687_v54 }
 0x241   :  { %1248 = vmatprep.subr.bf16.mxu1 %v1680_v61 }
 0x244   :  { %1249 = vmatpush1.bf16.msra.mxu1 %v1679_v60 }
 0x245   :  { %1250 = vmatprep.subr.bf16.mxu1 %v1672_v6 }
 0x248   :  { %1251 = vmatpush1.bf16.msra.mxu1 %v1671_v62 }
 0x249   :  { %1382 = vmatprep.subr.bf16.mxu1 %v1732_v14 }
 0x2d9   :  { %v679_v9 = vpop.f32.mrf.mxu0 }
 0x2da   :  { %v680_v14 = vadd.f32 %v679_v9, %v2265_v37 }
 0x2db   :  { %v681_v20 = vpop.f32.mrf.mxu0 }
 0x2dc   :  { %v682_v21 = vadd.f32 %v681_v20, %v562_v19 }
 0x2dd   :  { %v683_v22 = vpop.f32.mrf.mxu0 }
 0x2de   :  { %v1663_v26 = vmul.f32 -1.442695, %v682_v21  ;;  %v684_v32 = vadd.f32 %v683_v22, %v2265_v37  ;;  %v864_v22 = vld [vmem:[#allocation10 + $0x1b0] sm:$0xff] }
 0x2df   :  { %v685_v27 = vpop.f32.mrf.mxu0 }
 0x2e0   :  { %1893 = vpow2.f32 %v1663_v26  ;;  %v686_v29 = vadd.f32 %v685_v27, %v562_v19 }
 0x2e1   :  { %v2252_v33 = vpop.f32.mrf.mxu0 }
 0x2e2   :  { %v1664_v36 = vmul.f32 -1.442695, %v686_v29  ;;  %v718_v29 = vmax.f32 %v680_v14, 0.0  ;;  %v690_v9 = vadd.f32 %v2252_v33, %v2265_v37  ;;  %v853_v33 = vld [vmem:[#allocation10 + $0x158] sm:$0xff] }
 0x2e3   :  { %v691_v41 = vpop.f32.mrf.mxu0 }
 0x2e4   :  { %1895 = vpow2.f32 %v1664_v36  ;;  %v692_v31 = vadd.f32 %v691_v41, %v562_v19 }
 0x2e5   :  { %v2254_v42 = vpop.f32.mrf.mxu0 }
 0x2e6   :  { %v1665_v43 = vmul.f32 -1.442695, %v692_v31 }
 0x2e7   :  { %v695_v44 = vpop.f32.mrf.mxu0 }
 0x2e8   :  { %1897 = vpow2.f32 %v1665_v43  ;;  %v696_v45 = vadd.f32 %v695_v44, %v562_v19 }
 0x2ea   :  { %v1666_v13 = vmul.f32 -1.442695, %v696_v45  ;;  %v2256_v47 = vpop.f32.mrf.mxu0  ;;  %v860_v45 = vld [vmem:[#allocation10 + $0x190] sm:$0xff] }
 0x2ec   :  { %1899 = vpow2.f32 %v1666_v13  ;;  %v701_v18 = vpop.f32.mrf.mxu0 }
 0x2ed   :  { %v1894_v48 = vpop.eup %1893  ;;  %v702_v51 = vadd.f32 %v701_v18, %v562_v19  ;;  %v861_v18 = vld [vmem:[#allocation10 + $0x198] sm:$0xff] }
 0x2ee   :  { %v750_v52 = vadd.f32 1.0, %v1894_v48  ;;  %v2258_v35 = vpop.f32.mrf.mxu0  ;;  %v865_v48 = vld [vmem:[#allocation10 + $0x1b8] sm:$0xff] }
 0x2ef   :  { %v1667_v53 = vmul.f32 -1.442695, %v702_v51 }
 0x2f0   :  { %1901 = vrcp.f32 %v750_v52  ;;  %v705_v54 = vpop.f32.mrf.mxu0  ;;  %v694_v52 = vadd.f32 %v2254_v42, %v2265_v37 }
 0x2f1   :  { %v1896_v38 = vpop.eup %1895  ;;  %1903 = vpow2.f32 %v1667_v53  ;;  %v706_v55 = vadd.f32 %v705_v54, %v562_v19 }
 0x2f2   :  { %v751_v24 = vadd.f32 1.0, %v1896_v38  ;;  %v2260_v56 = vpop.f32.mrf.mxu0 }
 0x2f3   :  { %v1668_v39 = vmul.f32 -1.442695, %v706_v55  ;;  %v852_v55 = vld [vmem:[#allocation10 + $0x150] sm:$0xff] }
 0x2f4   :  { %1905 = vrcp.f32 %v751_v24  ;;  %v711_v61 = vpop.f32.mrf.mxu0 }
 0x2f5   :  { %v1898_v63 = vpop.eup %1897  ;;  %1907 = vpow2.f32 %v1668_v39  ;;  %v712_v60 = vadd.f32 %v711_v61, %v562_v19  ;;  %v2277_v39 = vcombine.high %v861_v18, %v865_v48  ;;  %v856_v61 = vld [vmem:[#allocation10 + $0x170] sm:$0xff] }
 0x2f6   :  { %v752_v0 = vadd.f32 1.0, %v1898_v63  ;;  %v2262_v34 = vpop.f32.mrf.mxu0  ;;  %v857_v63 = vld [vmem:[#allocation10 + $0x178] sm:$0xff] }
 0x2f7   :  { %v1669_v2 = vmul.f32 -1.442695, %v712_v60 }
 0x2f8   :  { %1909 = vrcp.f32 %v752_v0  ;;  %v715_v3 = vpop.f32.mrf.mxu0  ;;  %v1723_v0 = vcombine.low %v860_v45, %v864_v22 }
 0x2f9   :  { %v1900_v4 = vpop.eup %1899  ;;  %1911 = vpow2.f32 %v1669_v2  ;;  %v716_v6 = vadd.f32 %v715_v3, %v562_v19  ;;  %v719_v19 = vmax.f32 %v684_v32, 0.0  ;;  %v720_v3 = vmax.f32 %v690_v9, 0.0 }
 0x2fa   :  { %v753_v62 = vadd.f32 1.0, %v1900_v4  ;;  %v721_v4 = vmax.f32 %v694_v52, 0.0 }
 0x2fb   :  { %v1670_v1 = vmul.f32 -1.442695, %v716_v6 }
 0x2fc   :  { %1913 = vrcp.f32 %v753_v62 }
 0x2fd   :  { %v1902_v7 = vpop.eup %1901  ;;  %1915 = vpow2.f32 %v1670_v1  ;;  %v2286_v1 = vcombine.low %v861_v18, %v865_v48 }
 0x2fe   :  { %v1904_v30 = vpop.eup %1903  ;;  %v782_v20 = vsub.f32 1.0, %v1902_v7  ;;  %v774_v31 = vmul.f32 %v1902_v7, %v718_v29  ;;  %v1716_v7 = vcombine.high %v852_v55, %v856_v61 }
 0x2ff   :  { %v754_v21 = vadd.f32 1.0, %v1904_v30  ;;  %v2288_v30 = vcombine.high %v853_v33, %v857_v63 }
 0x300   :  { %v790_v17 = vmul.f32 %v782_v20, %v2193_v8 }
 0x301   :  { %v1906_v26 = vpop.eup %1905  ;;  %1917 = vrcp.f32 %v754_v21 }
 0x302   :  { %v1908_v27 = vpop.eup %1907  ;;  %v783_v36 = vsub.f32 1.0, %v1906_v26  ;;  %v775_v43 = vmul.f32 %v1906_v26, %v719_v19  ;;  %v798_v53 = vadd.f32 %v790_v17, %v774_v31  ;;  %v1715_v26 = vcombine.low %v852_v55, %v856_v61 }
 0x303   :  { %v755_v41 = vadd.f32 1.0, %v1908_v27  ;;  %v700_v19 = vadd.f32 %v2256_v47, %v2265_v37  ;;  %v837_v47 = vld [vmem:[#allocation10 + $0xd8] sm:$0xff] }
 0x304   :  { %v791_v44 = vmul.f32 %v783_v36, %v2195_v10  ;;  %v1724_v10 = vcombine.high %v860_v45, %v864_v22  ;;  %v704_v36 = vadd.f32 %v2258_v35, %v2265_v37  ;;  %v840_v45 = vld [vmem:[#allocation10 + $0xf0] sm:$0xff] }
 0x305   :  { %v1910_v13 = vpop.eup %1909  ;;  %1919 = vrcp.f32 %v755_v41  ;;  %v722_v18 = vmax.f32 %v700_v19, 0.0 }
 0x306   :  { %v1912_v51 = vpop.eup %1911  ;;  %v799_v8 = vadd.f32 %v791_v44, %v775_v43  ;;  %v784_v54 = vsub.f32 1.0, %v1910_v13  ;;  %v776_v14 = vmul.f32 %v1910_v13, %v720_v3  ;;  %v836_v44 = vld [vmem:[#allocation10 + $0xd0] sm:$0xff]  ;;  %v841_v13 = vld [vmem:[#allocation10 + $0xf8] sm:$0xff]  ;;  %v723_v48 = vmax.f32 %v704_v36, 0.0 }
 0x307   :  { %v756_v38 = vadd.f32 1.0, %v1912_v51 }
 0x308   :  { %v2275_v24 = vpack.c.bf16 %v799_v8, %v798_v53  ;;  %v792_v6 = vmul.f32 %v784_v54, %v2202_v23  ;;  %v844_v23 = vld [vmem:[#allocation10 + $0x110] sm:$0xff]  ;;  %v1700_v53 = vcombine.high %v836_v44, %v840_v45  ;;  %v2313_v8 = vcombine.high %v837_v47, %v841_v13 }
 0x309   :  { %v1914_v60 = vpop.eup %1913  ;;  %1921 = vrcp.f32 %v756_v38  ;;  %v1708_v31 = vcombine.high %v844_v23, %v848_v11  ;;  %v1707_v35 = vcombine.low %v844_v23, %v848_v11 }
 0x30a   :  { %v1916_v2 = vpop.eup %1915  ;;  %1269 = vmatmul.mubr.bf16.vlgmr.msra.gmra.mxu1 %v2275_v24  ;;  %1342 = vmatmul.mubr.bf16.vlgmr.msra.gmra.mxu0 %v2275_v24  ;;  %v785_v42 = vsub.f32 1.0, %v1914_v60  ;;  %v777_v32 = vmul.f32 %v1914_v60, %v721_v4  ;;  %v800_v27 = vadd.f32 %v792_v6, %v776_v14  ;;  %v833_v60 = vld [vmem:[#allocation10 + $0xb8] sm:$0xff]  ;;  %v820_v6 = vld [vmem:[#allocation10 + $0x50] sm:$0xff] }
 0x30b   :  { %v757_v62 = vadd.f32 1.0, %v1916_v2  ;;  %1383 = vmatpush1.bf16.msra.mxu1 %v1731_v15  ;;  %1456 = vmatpush1.bf16.msra.mxu0 %v2243_v16  ;;  %v849_v15 = vld [vmem:[#allocation10 + $0x138] sm:$0xff]  ;;  %v824_v14 = vld [vmem:[#allocation10 + $0x70] sm:$0xff] }
 0x30c   :  { %1384 = vmatprep.subr.bf16.mxu1 %v1724_v10  ;;  %1457 = vmatprep.subr.bf16.mxu0 %v2277_v39  ;;  %v793_v20 = vmul.f32 %v785_v42, %v2204_v25  ;;  %v2299_v25 = vcombine.low %v853_v33, %v857_v63  ;;  %v2304_v43 = vcombine.high %v845_v12, %v849_v15  ;;  %v828_v10 = vld [vmem:[#allocation10 + $0x90] sm:$0xff]  ;;  %v829_v63 = vld [vmem:[#allocation10 + $0x98] sm:$0xff] }
 0x30d   :  { %1923 = vrcp.f32 %v757_v62  ;;  %1278 = vmatprep.mubr.bf16.mxu1 %v2064_v28  ;;  %1351 = vmatprep.mubr.bf16.mxu0 %v2064_v28  ;;  %v2308_v22 = vcombine.low %v845_v12, %v849_v15  ;;  %v710_v33 = vadd.f32 %v2260_v56, %v2265_v37  ;;  %v1699_v42 = vcombine.low %v836_v44, %v840_v45  ;;  %v817_v44 = vld [vmem:[#allocation10 + $0x38] sm:$0xff] }
 0x30e   :  { %v1918_v21 = vpop.eup %1917  ;;  %v801_v29 = vadd.f32 %v793_v20, %v777_v32 }
 0x30f   :  { %1385 = vmatpush1.bf16.msra.mxu1 %v1723_v0  ;;  %1458 = vmatpush1.bf16.msra.mxu0 %v2286_v1  ;;  %v786_v17 = vsub.f32 1.0, %v1918_v21  ;;  %v778_v54 = vmul.f32 %v1918_v21, %v722_v18  ;;  %v714_v0 = vadd.f32 %v2262_v34, %v2265_v37  ;;  %v821_v34 = vld [vmem:[#allocation10 + $0x58] sm:$0xff]  ;;  %v724_v23 = vmax.f32 %v710_v33, 0.0 }
 0x310   :  { %1386 = vmatprep.subr.bf16.mxu1 %v1716_v7  ;;  %v2301_v41 = vpack.c.bf16 %v801_v29, %v800_v27  ;;  %1459 = vmatprep.subr.bf16.mxu0 %v2288_v30  ;;  %v2328_v7 = vcombine.high %v829_v63, %v833_v60  ;;  %v825_v37 = vld [vmem:[#allocation10 + $0x78] sm:$0xff]  ;;  %v1693_v21 = vcombine.low %v829_v63, %v833_v60 }
 0x311   :  { %v794_v52 = vmul.f32 %v786_v17, %v2219_v49  ;;  %v832_v49 = vld [vmem:[#allocation10 + $0xb0] sm:$0xff]  ;;  %v725_v11 = vmax.f32 %v714_v0, 0.0  ;;  %v1686_v27 = vcombine.high %v821_v34, %v825_v37 }
 0x312   :  { %v1920_v9 = vpop.eup %1919  ;;  %1279 = vmatmul.mubr.bf16.gmra.mxu1 %v2301_v41  ;;  %1352 = vmatmul.mubr.bf16.gmra.mxu0 %v2301_v41  ;;  %v1692_v62 = vcombine.high %v828_v10, %v832_v49  ;;  %v1691_v20 = vcombine.low %v828_v10, %v832_v49  ;;  %v812_v17 = vld [vmem:[#allocation10 + $0x10] sm:$0xff] }
 0x313   :  { %1387 = vmatpush1.bf16.msra.mxu1 %v1715_v26  ;;  %1460 = vmatpush1.bf16.msra.mxu0 %v2299_v25  ;;  %v787_v51 = vsub.f32 1.0, %v1920_v9  ;;  %v779_v38 = vmul.f32 %v1920_v9, %v723_v48  ;;  %v802_v2 = vadd.f32 %v794_v52, %v778_v54  ;;  %v1684_v26 = vcombine.high %v820_v6, %v824_v14 }
 0x314   :  { %1388 = vmatprep.subr.bf16.mxu1 %v1708_v31  ;;  %1461 = vmatprep.subr.bf16.mxu0 %v2304_v43  ;;  %v816_v31 = vld [vmem:[#allocation10 + $0x30] sm:$0xff]  ;;  %v1685_v9 = vcombine.low %v821_v34, %v825_v37 }
 0x315   :  { %1288 = vmatprep.mubr.bf16.mxu1 %v2064_v28  ;;  %1361 = vmatprep.mubr.bf16.mxu0 %v2064_v28  ;;  %v795_v55 = vmul.f32 %v787_v51, %v2221_v50  ;;  %v2323_v50 = vcombine.low %v837_v47, %v841_v13  ;;  %v1683_v13 = vcombine.low %v820_v6, %v824_v14 }
 0x316   :  { %v1922_v61 = vpop.eup %1921  ;;  %v1676_v18 = vcombine.high %v812_v17, %v816_v31 }
 0x317   :  { %1389 = vmatpush1.bf16.msra.mxu1 %v1707_v35  ;;  %1462 = vmatpush1.bf16.msra.mxu0 %v2308_v22  ;;  %v803_v3 = vadd.f32 %v795_v55, %v779_v38  ;;  %v788_v4 = vsub.f32 1.0, %v1922_v61  ;;  %v780_v29 = vmul.f32 %v1922_v61, %v724_v23 }
 0x318   :  { %1390 = vmatprep.subr.bf16.mxu1 %v1700_v53  ;;  %1463 = vmatprep.subr.bf16.mxu0 %v2313_v8 }
 0x319   :  { %v2326_v56 = vpack.c.bf16 %v803_v3, %v802_v2  ;;  %v796_v15 = vmul.f32 %v788_v4, %v2228_v46  ;;  %v813_v46 = vld [vmem:[#allocation10 + $0x18] sm:$0xff] }
 0x31a   :  { %v1924_v32 = vpop.eup %1923  ;;  %v1678_v48 = vcombine.high %v813_v46, %v817_v44  ;;  %v1677_v51 = vcombine.low %v813_v46, %v817_v44 }
 0x31b   :  { %1289 = vmatmul.mubr.bf16.gmra.mxu1 %v2326_v56  ;;  %1362 = vmatmul.mubr.bf16.gmra.mxu0 %v2326_v56  ;;  %v789_v12 = vsub.f32 1.0, %v1924_v32  ;;  %v781_v19 = vmul.f32 %v1924_v32, %v725_v11  ;;  %v804_v45 = vadd.f32 %v796_v15, %v780_v29 }
 0x31c   :  { %1391 = vmatpush1.bf16.msra.mxu1 %v1699_v42  ;;  %1464 = vmatpush1.bf16.msra.mxu0 %v2323_v50 }
 0x31d   :  { %1392 = vmatprep.subr.bf16.mxu1 %v1692_v62  ;;  %1465 = vmatprep.subr.bf16.mxu0 %v2328_v7  ;;  %v797_v36 = vmul.f32 %v789_v12, %v2230_v57  ;;  %v1675_v57 = vcombine.low %v812_v17, %v816_v31 }
 0x31e   :  { %1298 = vmatprep.mubr.bf16.mxu1 %v2064_v28  ;;  %1371 = vmatprep.mubr.bf16.mxu0 %v2064_v28 }
 0x31f   :  { %v805_v47 = vadd.f32 %v797_v36, %v781_v19 }
 0x320   :  { %1393 = vmatpush1.bf16.msra.mxu1 %v1691_v20  ;;  %1466 = vmatpush1.bf16.msra.mxu0 %v1693_v21 }
 0x321   :  { %1394 = vmatprep.subr.bf16.mxu1 %v1684_v26  ;;  %v809_v35 = vpack.c.bf16 %v805_v47, %v804_v45  ;;  %1467 = vmatprep.subr.bf16.mxu0 %v1686_v27 }
 0x323   :  { %1299 = vmatmul.mubr.bf16.gmra.mxu1 %v809_v35  ;;  %1372 = vmatmul.mubr.bf16.gmra.mxu0 %v809_v35 }
 0x324   :  { %1395 = vmatpush1.bf16.msra.mxu1 %v1683_v13  ;;  %1468 = vmatpush1.bf16.msra.mxu0 %v1685_v9 }
 0x325   :  { %1396 = vmatprep.subr.bf16.mxu1 %v1676_v18  ;;  %1469 = vmatprep.subr.bf16.mxu0 %v1678_v48  ;;  %v894_v18 = vsub.s32 4, %v2161_v58 }
 0x326   :  { %1414 = vmatprep.mubr.bf16.mxu1 %v2064_v28  ;;  %1487 = vmatprep.mubr.bf16.mxu0 %v2064_v28 }
 0x328   :  { %1397 = vmatpush1.bf16.msra.mxu1 %v1675_v57  ;;  %1470 = vmatpush1.bf16.msra.mxu0 %v1677_v51 }
 0x329   :  { %1771 = vmatprep.subr.bf16.mxu1 %v2245_v5  ;;  %v2367_v5 = vld [vmem:[%s2475_s7] sm:$0xff]  ;;  %s2065_s7 = smov [#allocation11]  }
 0x32a   :  { %s1597_s14 = sshll.u32 %s2065_s7, 4  ;;  %s1598_s14 = int_to_ptr.vmem [resolvable:$true] %s1597_s14 }
 0x32b   :  { %1415 = vmatmul.mubr.bf16.vlgmr.msra.gmra.mxu1 %v2275_v24  ;;  %1488 = vmatmul.mubr.bf16.vlgmr.msra.gmra.mxu0 %v2275_v24  ;;  %v890_v24 = vsub.s32 3, %v2161_v58  ;;  %s2025_s15 = scalar_lea.vmem %s1598_s14, 8192  ;;  %p2030_p12 = scmp.lt.s32.totalorder %s1598_s14, %s1598_s14 }
 0x32c   :  { %1779 = vmatpush1.bf16.msra.mxu1 %v2243_v16  ;;  %1424 = vmatprep.mubr.bf16.mxu1 %v2064_v28  ;;  %v886_v16 = vsub.s32 2, %v2161_v58  ;;  %p2026_p11 = scmp.ne.s32.totalorder %s1598_s14, %s2025_s15  ;;  %p2031_p13 = scmp.lt.s32.totalorder %s2025_s15, %s2025_s15 }
 0x32d   :  { %1772 = vmatprep.subr.bf16.mxu1 %v2277_v39  ;;  %1497 = vmatprep.mubr.bf16.mxu0 %v2064_v28  ;;  %v2372_v39 = vrot.slane %v2367_v5, %v2181_v40 }
 0x32e   :  { %p2032_p0 = por %p2031_p13, %p2030_p12 }
 0x330   :  { %1780 = vmatpush1.bf16.msra.mxu1 %v2286_v1  ;;  %v2375_v1 = vrot.slane %v2367_v5, %v886_v16  ;;  %p2033_p1 = pnand %p2032_p0, %p2026_p11 }
 0x331   :  { %1773 = vmatprep.subr.bf16.mxu1 %v2288_v30  ;;  %v2382_v30 = vrot.slane %v2367_v5, %v890_v24 }
 0x333   :  { %1425 = vmatmul.mubr.bf16.gmra.mxu1 %v2301_v41  ;;  %1498 = vmatmul.mubr.bf16.gmra.mxu0 %v2301_v41 }
 0x334   :  { %1781 = vmatpush1.bf16.msra.mxu1 %v2299_v25  ;;  %1434 = vmatprep.mubr.bf16.mxu1 %v2064_v28 }
 0x335   :  { %1774 = vmatprep.subr.bf16.mxu1 %v2304_v43 }
 0x338   :  { %1782 = vmatpush1.bf16.msra.mxu1 %v2308_v22 }
 0x339   :  { %1775 = vmatprep.subr.bf16.mxu1 %v2313_v8 }
 0x33b   :  { %1435 = vmatmul.mubr.bf16.gmra.mxu1 %v2326_v56 }
 0x33c   :  { %1783 = vmatpush1.bf16.msra.mxu1 %v2323_v50  ;;  %1444 = vmatprep.mubr.bf16.mxu1 %v2064_v28 }
 0x33d   :  { %1776 = vmatprep.subr.bf16.mxu1 %v2328_v7 }
 0x340   :  { %1784 = vmatpush1.bf16.msra.mxu1 %v1693_v21 }
 0x341   :  { %1777 = vmatprep.subr.bf16.mxu1 %v1686_v27 }
 0x343   :  { %1445 = vmatmul.mubr.bf16.gmra.mxu1 %v809_v35 }
 0x344   :  { %1785 = vmatpush1.bf16.msra.mxu1 %v1685_v9  ;;  %1507 = vmatprep.mubr.bf16.mxu1 %v2064_v28 }
 0x345   :  { %1778 = vmatprep.subr.bf16.mxu1 %v1678_v48  ;;  %v902_v48 = vsub.s32 6, %v2161_v58 }
 0x348   :  { %1786 = vmatpush1.bf16.msra.mxu1 %v1677_v51 }
 0x34b   :  { %1508 = vmatmul.mubr.bf16.vlgmr.msra.gmra.mxu1 %v2326_v56 }
 0x34c   :  { %1517 = vmatprep.mubr.bf16.mxu1 %v2064_v28  ;;  %v2379_v28 = vrot.slane %v2367_v5, %v2164_v59 }
 0x353   :  { %1518 = vmatmul.mubr.bf16.gmra.mxu1 %v809_v35 }
 0x3ca   :  { %v1270_v25 = vpop.f32.mrf.mxu1  ;;  %v1343_v41 = vpop.f32.mrf.mxu0 }
 0x3cb   :  { %v1271_v43 = vadd.f32 %v1270_v25, %v2372_v39  ;;  %v1344_v22 = vadd.f32 %v1343_v41, %v2375_v1  ;;  %v898_v25 = vsub.s32 5, %v2161_v58  ;;  %v906_v41 = vsub.s32 7, %v2161_v58 }
 0x3cc   :  { %v1272_v52 = vpop.f32.mrf.mxu1  ;;  %v1345_v53 = vpop.f32.mrf.mxu0 }
 0x3cd   :  { %1528 = vst [vmem:[#allocation11] sm:$0xff] %v1271_v43  ;;  %1530 = vst [vmem:[#allocation11 + $0x10] sm:$0xff] %v1344_v22  ;;  %v1273_v40 = vadd.f32 %v1272_v52, %v2379_v28  ;;  %v1346_v8 = vadd.f32 %v1345_v53, %v2382_v30 }
 0x3ce   :  { %v1274_v54 = vpop.f32.mrf.mxu1  ;;  %v1347_v59 = vpop.f32.mrf.mxu0 }
 0x3cf   :  { %1529 = vst [vmem:[#allocation11 + $0x8] sm:$0xff] %v1273_v40  ;;  %1531 = vst [vmem:[#allocation11 + $0x18] sm:$0xff] %v1346_v8  ;;  %v1275_v38 = vadd.f32 %v1274_v54, %v2372_v39  ;;  %v1348_v55 = vadd.f32 %v1347_v59, %v2375_v1  ;;  %v2419_v40 = vrot.slane %v2367_v5, %v894_v18 }
 0x3d0   :  { %v1276_v10 = vpop.f32.mrf.mxu1  ;;  %v1349_v61 = vpop.f32.mrf.mxu0  ;;  %v2422_v8 = vrot.slane %v2367_v5, %v902_v48 }
 0x3d1   :  { %1536 = vst [vmem:[#allocation11 + $0x40] sm:$0xff] %v1275_v38  ;;  %1538 = vst [vmem:[#allocation11 + $0x50] sm:$0xff] %v1348_v55  ;;  %v1277_v33 = vadd.f32 %v1276_v10, %v2379_v28  ;;  %v1350_v49 = vadd.f32 %v1349_v61, %v2382_v30  ;;  %v2427_v55 = vrot.slane %v2367_v5, %v898_v25 }
 0x3d2   :  { %v1280_v63 = vpop.f32.mrf.mxu1  ;;  %v1353_v60 = vpop.f32.mrf.mxu0 }
 0x3d3   :  { %1537 = vst [vmem:[#allocation11 + $0x48] sm:$0xff] %v1277_v33  ;;  %1539 = vst [vmem:[#allocation11 + $0x58] sm:$0xff] %v1350_v49  ;;  %v1281_v0 = vadd.f32 %v1280_v63, %v2372_v39  ;;  %v1354_v2 = vadd.f32 %v1353_v60, %v2375_v1 }
 0x3d4   :  { %v1282_v3 = vpop.f32.mrf.mxu1  ;;  %v1355_v4 = vpop.f32.mrf.mxu0 }
 0x3d5   :  { %1544 = vst [vmem:[#allocation11 + $0x80] sm:$0xff] %v1281_v0  ;;  %1546 = vst [vmem:[#allocation11 + $0x90] sm:$0xff] %v1354_v2  ;;  %v1283_v42 = vadd.f32 %v1282_v3, %v2379_v28  ;;  %v1356_v50 = vadd.f32 %v1355_v4, %v2382_v30 }
 0x3d6   :  { %v1284_v6 = vpop.f32.mrf.mxu1  ;;  %v1357_v56 = vpop.f32.mrf.mxu0 }
 0x3d7   :  { %1545 = vst [vmem:[#allocation11 + $0x88] sm:$0xff] %v1283_v42  ;;  %1547 = vst [vmem:[#allocation11 + $0x98] sm:$0xff] %v1356_v50  ;;  %v1285_v62 = vadd.f32 %v1284_v6, %v2372_v39  ;;  %v1358_v7 = vadd.f32 %v1357_v56, %v2375_v1 }
 0x3d8   :  { %v1286_v14 = vpop.f32.mrf.mxu1  ;;  %v1359_v34 = vpop.f32.mrf.mxu0 }
 0x3d9   :  { %1552 = vst [vmem:[#allocation11 + $0xc0] sm:$0xff] %v1285_v62  ;;  %1554 = vst [vmem:[#allocation11 + $0xd0] sm:$0xff] %v1358_v7  ;;  %v1287_v37 = vadd.f32 %v1286_v14, %v2379_v28  ;;  %v1360_v32 = vadd.f32 %v1359_v34, %v2382_v30 }
 0x3db   :  { %1553 = vst [vmem:[#allocation11 + $0xc8] sm:$0xff] %v1287_v37  ;;  %1555 = vst [vmem:[#allocation11 + $0xd8] sm:$0xff] %v1360_v32  ;;  %v1290_v20 = vpop.f32.mrf.mxu1  ;;  %v1363_v23 = vpop.f32.mrf.mxu0 }
 0x3dc   :  { %v1291_v11 = vadd.f32 %v1290_v20, %v2372_v39  ;;  %v1364_v12 = vadd.f32 %v1363_v23, %v2375_v1 }
 0x3dd   :  { %v1292_v15 = vpop.f32.mrf.mxu1  ;;  %v1365_v21 = vpop.f32.mrf.mxu0 }
 0x3de   :  { %1560 = vst [vmem:[#allocation11 + $0x100] sm:$0xff] %v1291_v11  ;;  %1562 = vst [vmem:[#allocation11 + $0x110] sm:$0xff] %v1364_v12  ;;  %v1293_v26 = vadd.f32 %v1292_v15, %v2379_v28  ;;  %v1366_v27 = vadd.f32 %v1365_v21, %v2382_v30 }
 0x3df   :  { %v1294_v29 = vpop.f32.mrf.mxu1  ;;  %v1367_v19 = vpop.f32.mrf.mxu0 }
 0x3e0   :  { %1561 = vst [vmem:[#allocation11 + $0x108] sm:$0xff] %v1293_v26  ;;  %1563 = vst [vmem:[#allocation11 + $0x118] sm:$0xff] %v1366_v27  ;;  %v1295_v36 = vadd.f32 %v1294_v29, %v2372_v39  ;;  %v1368_v17 = vadd.f32 %v1367_v19, %v2375_v1 }
 0x3e1   :  { %v1296_v31 = vpop.f32.mrf.mxu1  ;;  %v1369_v46 = vpop.f32.mrf.mxu0 }
 0x3e2   :  { %1568 = vst [vmem:[#allocation11 + $0x140] sm:$0xff] %v1295_v36  ;;  %1570 = vst [vmem:[#allocation11 + $0x150] sm:$0xff] %v1368_v17  ;;  %v1297_v44 = vadd.f32 %v1296_v31, %v2379_v28  ;;  %v1370_v45 = vadd.f32 %v1369_v46, %v2382_v30 }
 0x3e3   :  { %v1300_v47 = vpop.f32.mrf.mxu1  ;;  %v1373_v13 = vpop.f32.mrf.mxu0 }
 0x3e4   :  { %1569 = vst [vmem:[#allocation11 + $0x148] sm:$0xff] %v1297_v44  ;;  %1571 = vst [vmem:[#allocation11 + $0x158] sm:$0xff] %v1370_v45  ;;  %v1301_v9 = vadd.f32 %v1300_v47, %v2372_v39  ;;  %v1374_v35 = vadd.f32 %v1373_v13, %v2375_v1 }
 0x3e5   :  { %v1302_v57 = vpop.f32.mrf.mxu1  ;;  %v1375_v51 = vpop.f32.mrf.mxu0 }
 0x3e6   :  { %1576 = vst [vmem:[#allocation11 + $0x180] sm:$0xff] %v1301_v9  ;;  %1578 = vst [vmem:[#allocation11 + $0x190] sm:$0xff] %v1374_v35  ;;  %v1303_v16 = vadd.f32 %v1302_v57, %v2379_v28  ;;  %v1376_v24 = vadd.f32 %v1375_v51, %v2382_v30 }
 0x3e7   :  { %v1304_v43 = vpop.f32.mrf.mxu1  ;;  %v1377_v22 = vpop.f32.mrf.mxu0 }
 0x3e8   :  { %1577 = vst [vmem:[#allocation11 + $0x188] sm:$0xff] %v1303_v16  ;;  %1579 = vst [vmem:[#allocation11 + $0x198] sm:$0xff] %v1376_v24  ;;  %v1305_v52 = vadd.f32 %v1304_v43, %v2372_v39  ;;  %v1378_v53 = vadd.f32 %v1377_v22, %v2375_v1  ;;  %v2430_v39 = vrot.slane %v2367_v5, %v906_v41 }
 0x3e9   :  { %v1306_v54 = vpop.f32.mrf.mxu1  ;;  %v1379_v59 = vpop.f32.mrf.mxu0 }
 0x3ea   :  { %1584 = vst [vmem:[#allocation11 + $0x1c0] sm:$0xff] %v1305_v52  ;;  %1586 = vst [vmem:[#allocation11 + $0x1d0] sm:$0xff] %v1378_v53  ;;  %v1307_v58 = vadd.f32 %v1306_v54, %v2379_v28  ;;  %v1380_v38 = vadd.f32 %v1379_v59, %v2382_v30 }
 0x3eb   :  { %v1416_v1 = vpop.f32.mrf.mxu1  ;;  %v1489_v10 = vpop.f32.mrf.mxu0 }
 0x3ec   :  { %1585 = vst [vmem:[#allocation11 + $0x1c8] sm:$0xff] %v1307_v58  ;;  %1587 = vst [vmem:[#allocation11 + $0x1d8] sm:$0xff] %v1380_v38  ;;  %v1417_v61 = vadd.f32 %v1416_v1, %v2419_v40  ;;  %v1490_v33 = vadd.f32 %v1489_v10, %v2422_v8 }
 0x3ed   :  { %v1418_v49 = vpop.f32.mrf.mxu1  ;;  %v1491_v63 = vpop.f32.mrf.mxu0 }
 0x3ee   :  { %1532 = vst [vmem:[#allocation11 + $0x20] sm:$0xff] %v1417_v61  ;;  %1534 = vst [vmem:[#allocation11 + $0x30] sm:$0xff] %v1490_v33  ;;  %v1419_v28 = vadd.f32 %v1418_v49, %v2427_v55  ;;  %v1492_v30 = vadd.f32 %v1491_v63, %v2430_v39 }
 0x3ef   :  { %v1420_v60 = vpop.f32.mrf.mxu1  ;;  %v1493_v0 = vpop.f32.mrf.mxu0 }
 0x3f0   :  { %1533 = vst [vmem:[#allocation11 + $0x28] sm:$0xff] %v1419_v28  ;;  %1535 = vst [vmem:[#allocation11 + $0x38] sm:$0xff] %v1492_v30  ;;  %v1421_v5 = vadd.f32 %v1420_v60, %v2419_v40  ;;  %v1494_v2 = vadd.f32 %v1493_v0, %v2422_v8 }
 0x3f1   :  { %v1422_v3 = vpop.f32.mrf.mxu1  ;;  %v1495_v4 = vpop.f32.mrf.mxu0 }
 0x3f2   :  { %1540 = vst [vmem:[#allocation11 + $0x60] sm:$0xff] %v1421_v5  ;;  %1542 = vst [vmem:[#allocation11 + $0x70] sm:$0xff] %v1494_v2  ;;  %v1423_v42 = vadd.f32 %v1422_v3, %v2427_v55  ;;  %v1496_v50 = vadd.f32 %v1495_v4, %v2430_v39 }
 0x3f3   :  { %v1426_v6 = vpop.f32.mrf.mxu1  ;;  %v1499_v56 = vpop.f32.mrf.mxu0 }
 0x3f4   :  { %1541 = vst [vmem:[#allocation11 + $0x68] sm:$0xff] %v1423_v42  ;;  %1543 = vst [vmem:[#allocation11 + $0x78] sm:$0xff] %v1496_v50  ;;  %v1427_v62 = vadd.f32 %v1426_v6, %v2419_v40  ;;  %v1500_v7 = vadd.f32 %v1499_v56, %v2422_v8 }
 0x3f5   :  { %v1428_v14 = vpop.f32.mrf.mxu1  ;;  %v1501_v34 = vpop.f32.mrf.mxu0 }
 0x3f6   :  { %1548 = vst [vmem:[#allocation11 + $0xa0] sm:$0xff] %v1427_v62  ;;  %1550 = vst [vmem:[#allocation11 + $0xb0] sm:$0xff] %v1500_v7  ;;  %v1429_v37 = vadd.f32 %v1428_v14, %v2427_v55  ;;  %v1502_v32 = vadd.f32 %v1501_v34, %v2430_v39 }
 0x3f7   :  { %v1430_v20 = vpop.f32.mrf.mxu1  ;;  %v1503_v23 = vpop.f32.mrf.mxu0 }
 0x3f8   :  { %1549 = vst [vmem:[#allocation11 + $0xa8] sm:$0xff] %v1429_v37  ;;  %1551 = vst [vmem:[#allocation11 + $0xb8] sm:$0xff] %v1502_v32  ;;  %v1431_v11 = vadd.f32 %v1430_v20, %v2419_v40  ;;  %v1504_v12 = vadd.f32 %v1503_v23, %v2422_v8 }
 0x3f9   :  { %v1432_v15 = vpop.f32.mrf.mxu1  ;;  %v1505_v21 = vpop.f32.mrf.mxu0 }
 0x3fa   :  { %1556 = vst [vmem:[#allocation11 + $0xe0] sm:$0xff] %v1431_v11  ;;  %1558 = vst [vmem:[#allocation11 + $0xf0] sm:$0xff] %v1504_v12  ;;  %v1433_v26 = vadd.f32 %v1432_v15, %v2427_v55  ;;  %v1506_v27 = vadd.f32 %v1505_v21, %v2430_v39 }
 0x3fb   :  { %v1436_v29 = vpop.f32.mrf.mxu1 }
 0x3fc   :  { %1557 = vst [vmem:[#allocation11 + $0xe8] sm:$0xff] %v1433_v26  ;;  %1559 = vst [vmem:[#allocation11 + $0xf8] sm:$0xff] %v1506_v27  ;;  %v1437_v19 = vadd.f32 %v1436_v29, %v2419_v40 }
 0x3fd   :  { %v1438_v36 = vpop.f32.mrf.mxu1 }
 0x3fe   :  { %1564 = vst [vmem:[#allocation11 + $0x120] sm:$0xff] %v1437_v19  ;;  %v1439_v17 = vadd.f32 %v1438_v36, %v2427_v55 }
 0x3ff   :  { %v1440_v31 = vpop.f32.mrf.mxu1 }
 0x400   :  { %1565 = vst [vmem:[#allocation11 + $0x128] sm:$0xff] %v1439_v17  ;;  %v1441_v46 = vadd.f32 %v1440_v31, %v2419_v40 }
 0x401   :  { %v1442_v44 = vpop.f32.mrf.mxu1 }
 0x402   :  { %1572 = vst [vmem:[#allocation11 + $0x160] sm:$0xff] %v1441_v46  ;;  %v1443_v45 = vadd.f32 %v1442_v44, %v2427_v55 }
 0x403   :  { %v1446_v47 = vpop.f32.mrf.mxu1 }
 0x404   :  { %1573 = vst [vmem:[#allocation11 + $0x168] sm:$0xff] %v1443_v45  ;;  %v1447_v13 = vadd.f32 %v1446_v47, %v2419_v40 }
 0x405   :  { %v1448_v9 = vpop.f32.mrf.mxu1 }
 0x406   :  { %1580 = vst [vmem:[#allocation11 + $0x1a0] sm:$0xff] %v1447_v13  ;;  %v1449_v35 = vadd.f32 %v1448_v9, %v2427_v55 }
 0x407   :  { %v1450_v18 = vpop.f32.mrf.mxu1 }
 0x408   :  { %1581 = vst [vmem:[#allocation11 + $0x1a8] sm:$0xff] %v1449_v35  ;;  %v1451_v48 = vadd.f32 %v1450_v18, %v2419_v40 }
 0x409   :  { %v1452_v57 = vpop.f32.mrf.mxu1 }
 0x40a   :  { %1588 = vst [vmem:[#allocation11 + $0x1e0] sm:$0xff] %v1451_v48  ;;  %v1453_v51 = vadd.f32 %v1452_v57, %v2427_v55 }
 0x40b   :  { %v1509_v16 = vpop.f32.mrf.mxu1 }
 0x40c   :  { %1589 = vst [vmem:[#allocation11 + $0x1e8] sm:$0xff] %v1453_v51  ;;  %v1510_v24 = vadd.f32 %v1509_v16, %v2422_v8 }
 0x40d   :  { %v1511_v25 = vpop.f32.mrf.mxu1 }
 0x40e   :  { %1566 = vst [vmem:[#allocation11 + $0x130] sm:$0xff] %v1510_v24  ;;  %v1512_v41 = vadd.f32 %v1511_v25, %v2430_v39 }
 0x40f   :  { %v1513_v43 = vpop.f32.mrf.mxu1 }
 0x410   :  { %1567 = vst [vmem:[#allocation11 + $0x138] sm:$0xff] %v1512_v41  ;;  %v1514_v22 = vadd.f32 %v1513_v43, %v2422_v8 }
 0x411   :  { %v1515_v52 = vpop.f32.mrf.mxu1 }
 0x412   :  { %1574 = vst [vmem:[#allocation11 + $0x170] sm:$0xff] %v1514_v22  ;;  %v1516_v53 = vadd.f32 %v1515_v52, %v2430_v39 }
 0x413   :  { %v1519_v40 = vpop.f32.mrf.mxu1 }
 0x414   :  { %1575 = vst [vmem:[#allocation11 + $0x178] sm:$0xff] %v1516_v53  ;;  %v1520_v54 = vadd.f32 %v1519_v40, %v2422_v8 }
 0x415   :  { %v1521_v59 = vpop.f32.mrf.mxu1 }
 0x416   :  { %1582 = vst [vmem:[#allocation11 + $0x1b0] sm:$0xff] %v1520_v54  ;;  %v1522_v58 = vadd.f32 %v1521_v59, %v2430_v39 }
 0x417   :  { %v1523_v38 = vpop.f32.mrf.mxu1 }
 0x418   :  { %1583 = vst [vmem:[#allocation11 + $0x1b8] sm:$0xff] %v1522_v58  ;;  %v1524_v55 = vadd.f32 %v1523_v38, %v2422_v8 }
 0x419   :  { %v1525_v1 = vpop.f32.mrf.mxu1 }
 0x41a   :  { %1590 = vst [vmem:[#allocation11 + $0x1f0] sm:$0xff] %v1524_v55  ;;  %v1526_v10 = vadd.f32 %v1525_v1, %v2430_v39 }
 0x41c   :  { %1591 = vst [vmem:[#allocation11 + $0x1f8] sm:$0xff] %v1526_v10 }
 0x41d   :  { %2036 = shalt.err (!%p2033_p1)
}
 0x41e   :  { %s2066_s16 = smov 1024  }
 0x41f   :  { %1603 = dma.vmem_to_hbm [thread:$0]  %s1598_s14, 8192, %s2476_s8, [#allocation4], %s2066_s16, %s2066_s16, %s2054_s30  }
 0x420   :  { %2051 = dma.done.wait [#allocation4], 8192  }
 0x421   :  { %2052 = vsyncadd [#allocation4], 4294959104 }
 0x422   :  { %1607 = vsyncpa [#allocation3], 1 }
 0x423   :  { %1608 = vsyncpa [#allocation6], 1 }
 0x424   :  { %1609 = vsyncpa [#allocation9], 1 }
 0x425   :  { %1610 = vsyncpa [#allocation4], 1 }

</bundles_post_ra>
